<compile_context>
chip_gen: v5e
topology: v5e:2x2
jax: 0.10.0
libtpu: 0.0.40
codegen_flags: <defaults>
</compile_context>

<pallas_src>
import jax
import jax.numpy as jnp
import numpy as np
from jax import lax
from jax.experimental import pallas as pl
from jax.experimental.pallas import tpu as pltpu

_EPS = 1e-5  # torch.nn.LayerNorm default eps


def _pick_row_tile(L, target=256):
    """Largest divisor of L that is <= target (prefer multiples of 8)."""
    if L <= target:
        return L
    best = 1
    for t in range(target, 0, -1):
        if L % t == 0:
            if t % 8 == 0:
                return t
            best = max(best, t)
    return best


def _device_defaults(B):
    """(num_batch_blocks, vmem_limit_bytes) chosen per TPU generation."""
    vmem_cap = 128 * 1024 * 1024
    try:
        vmem_cap = int(getattr(pltpu.get_tpu_info(), "vmem_capacity_bytes",
                               vmem_cap))
    except Exception:
        pass
    if vmem_cap <= 80 * 1024 * 1024:
        # v7x-class (64 MiB VMEM, 2 TensorCores): >=2 batch blocks so the
        # "parallel" batch axis shards across both cores; stay well under VMEM.
        nb = 2 if B % 2 == 0 else 1
        vmem_limit = 52 * 1024 * 1024
    else:
        # v5e/v6e (128 MiB VMEM, 1 TensorCore): one batch block -> each layer's
        # weights are streamed exactly once; allow a larger scoped VMEM.
        nb = 1
        vmem_limit = 96 * 1024 * 1024
    return nb, vmem_limit


def _make_kernel(num_heads, head_dim, row_tile, scale):
    nh, dh, QT = num_heads, head_dim, row_tile
    bf16 = jnp.bfloat16

    def layer_norm(v, g, b):
        # one-pass statistics, clamped (E[x^2]-E[x]^2 can go slightly negative)
        mu = jnp.mean(v, axis=-1, keepdims=True)
        ms = jnp.mean(v * v, axis=-1, keepdims=True)
        var = jnp.maximum(ms - mu * mu, 0.0)
        return (v - mu) * lax.rsqrt(var + _EPS) * g + b

    def kernel(x_ref, bias_ref,
               ln1g_ref, ln1b_ref, wq_ref, wk_ref, wv_ref, wo_ref,
               ln2g_ref, ln2b_ref, w1_ref, b1_ref, w2_ref, b2_ref,
               lnfg_ref, lnfb_ref,
               out_ref, q_scr):
        n = pl.program_id(1)                      # layer index (inner axis)
        num_layers = pl.num_programs(1)

        @pl.when(n == 0)
        def _():
            out_ref[...] = x_ref[...].astype(jnp.float32)

        x = out_ref[...]                          # (Bt, L, H) f32 carried act
        bias = bias_ref[...]                      # (Bt, 1, L) f32
        Bt, L, H = x.shape
        n_tiles = L // QT

        # ---------- self-attention sublayer: x <- x + Attn(LN1(x)) ----------
        y = layer_norm(x, ln1g_ref[0], ln1b_ref[0]).astype(bf16)
        y2 = y.reshape(Bt * L, H)
        q = jnp.dot(y2, wq_ref[0], preferred_element_type=jnp.float32) * scale
        q_scr[...] = q.astype(bf16).reshape(Bt, L, H)
        k = jnp.dot(y2, wk_ref[0],
                    preferred_element_type=jnp.float32).astype(bf16)
        v = jnp.dot(y2, wv_ref[0],
                    preferred_element_type=jnp.float32).astype(bf16)
        k = k.reshape(Bt, L, H)
        v = v.reshape(Bt, L, H)
        wo = wo_ref[0]

        def attn_tile(i, carry):
            qs = pl.multiple_of(i * QT, QT)
            x_t = out_ref[:, pl.ds(qs, QT), :]        # (Bt, QT, H) f32
            q_t = q_scr[:, pl.ds(qs, QT), :]          # (Bt, QT, H) bf16
            ctx_parts = []
            for h in range(nh):                       # contiguous lane slices,
                sl = slice(h * dh, (h + 1) * dh)      # no head transposes
                logits = jnp.einsum('bqd,bkd->bqk', q_t[:, :, sl], k[:, :, sl],
                                    preferred_element_type=jnp.float32)
                logits = logits + bias                # (Bt, QT, L)
                m = jnp.max(logits, axis=-1, keepdims=True)
                p = jnp.exp(logits - m)
                denom = jnp.sum(p, axis=-1, keepdims=True)
                p = (p * pl.reciprocal(denom, approx=True)).astype(bf16)
                ctx_parts.append(
                    jnp.einsum('bqk,bkd->bqd', p, v[:, :, sl],
                               preferred_element_type=jnp.float32).astype(bf16))
            ctx = jnp.concatenate(ctx_parts, axis=-1)  # (Bt, QT, H) bf16
            attn = jnp.dot(ctx.reshape(Bt * QT, H), wo,
                           preferred_element_type=jnp.float32)
            out_ref[:, pl.ds(qs, QT), :] = x_t + attn.reshape(Bt, QT, H)
            return carry

        lax.fori_loop(0, n_tiles, attn_tile, 0)

        # ---------- feed-forward sublayer: x <- x + FFN(LN2(x)) ----------
        w1 = w1_ref[0]
        b1 = b1_ref[0]
        w2 = w2_ref[0]
        b2 = b2_ref[0]
        ln2g = ln2g_ref[0]
        ln2b = ln2b_ref[0]

        def ffn_tile(i, carry):
            rs = pl.multiple_of(i * QT, QT)
            x_t = out_ref[:, pl.ds(rs, QT), :]        # (Bt, QT, H) f32
            y_t = layer_norm(x_t, ln2g, ln2b).astype(bf16).reshape(Bt * QT, H)
            hmid = jnp.dot(y_t, w1, preferred_element_type=jnp.float32) + b1
            hmid = jnp.maximum(hmid, 0.0).astype(bf16)
            ffn = jnp.dot(hmid, w2, preferred_element_type=jnp.float32) + b2
            out_ref[:, pl.ds(rs, QT), :] = x_t + ffn.reshape(Bt, QT, H)
            return carry

        lax.fori_loop(0, n_tiles, ffn_tile, 0)

        @pl.when(n == num_layers - 1)
        def _():
            out_ref[...] = layer_norm(out_ref[...], lnfg_ref[...], lnfb_ref[...])

    return kernel


def encoder_stack(params, encoder_inputs, attention_bias,
                  inputs_padding=None, training=False, *, batch_block=None):
    """Pallas forward of EncoderStack.  inputs_padding/training unused (parity)."""
    del inputs_padding, training
    B, L, H = encoder_inputs.shape
    NL = params['wq'].shape[0]
    F = params['w1'].shape[-1]
    num_heads = params['num_heads']
    head_dim = H // num_heads

    nb_auto, vmem_limit = _device_defaults(B)
    bt = (B // nb_auto) if batch_block is None else batch_block
    assert B % bt == 0, "batch must be divisible by batch_block"
    nb = B // bt

    QT = _pick_row_tile(L)
    scale = float(head_dim) ** -0.5

    bf16 = jnp.bfloat16
    wq = params['wq'].astype(bf16)
    wk = params['wk'].astype(bf16)
    wv = params['wv'].astype(bf16)
    wo = params['wo'].astype(bf16)
    w1 = params['w1'].astype(bf16)
    w2 = params['w2'].astype(bf16)

    x_in = encoder_inputs.astype(jnp.float32)
    bias3 = attention_bias.reshape(B, 1, L).astype(jnp.float32)

    in_specs = [
        pl.BlockSpec((bt, L, H), lambda b, n: (b, 0, 0)),     # x (layer-0 init)
        pl.BlockSpec((bt, 1, L), lambda b, n: (b, 0, 0)),     # attention bias
        pl.BlockSpec((1, 1, H), lambda b, n: (n, 0, 0)),      # ln1 gamma
        pl.BlockSpec((1, 1, H), lambda b, n: (n, 0, 0)),      # ln1 beta
        pl.BlockSpec((1, H, H), lambda b, n: (n, 0, 0)),      # Wq
        pl.BlockSpec((1, H, H), lambda b, n: (n, 0, 0)),      # Wk
        pl.BlockSpec((1, H, H), lambda b, n: (n, 0, 0)),      # Wv
        pl.BlockSpec((1, H, H), lambda b, n: (n, 0, 0)),      # Wo
        pl.BlockSpec((1, 1, H), lambda b, n: (n, 0, 0)),      # ln2 gamma
        pl.BlockSpec((1, 1, H), lambda b, n: (n, 0, 0)),      # ln2 beta
        pl.BlockSpec((1, H, F), lambda b, n: (n, 0, 0)),      # W1
        pl.BlockSpec((1, 1, F), lambda b, n: (n, 0, 0)),      # b1
        pl.BlockSpec((1, F, H), lambda b, n: (n, 0, 0)),      # W2
        pl.BlockSpec((1, 1, H), lambda b, n: (n, 0, 0)),      # b2
        pl.BlockSpec((1, H), lambda b, n: (0, 0)),            # final LN gamma
        pl.BlockSpec((1, H), lambda b, n: (0, 0)),            # final LN beta
    ]
    # Output block index depends only on the batch axis -> it stays resident in
    # VMEM across the layer axis and doubles as the activation carry.
    out_spec = pl.BlockSpec((bt, L, H), lambda b, n: (b, 0, 0))

    kernel = _make_kernel(num_heads, head_dim, QT, scale)
    return pl.pallas_call(
        kernel,
        out_shape=jax.ShapeDtypeStruct((B, L, H), jnp.float32),
        grid_spec=pltpu.PrefetchScalarGridSpec(
            num_scalar_prefetch=0,
            grid=(nb, NL),                       # (batch blocks, layers)
            in_specs=in_specs,
            out_specs=out_spec,
            scratch_shapes=[pltpu.VMEM((bt, L, H), jnp.bfloat16)],  # scaled q
        ),
        compiler_params=pltpu.CompilerParams(
            dimension_semantics=("parallel", "arbitrary"),
            vmem_limit_bytes=vmem_limit,
        ),
    )(x_in, bias3,
      params['ln1_g'], params['ln1_b'], wq, wk, wv, wo,
      params['ln2_g'], params['ln2_b'], w1, params['b1'], w2, params['b2'],
      params['lnf_g'], params['lnf_b'])


def init_params(key, hidden, num_layers, num_heads, filter_size):
    keys = jax.random.split(key, 12)
    f32 = jnp.float32
    std = 0.05

    def nrm(k, shape):
        return (std * jax.random.normal(k, shape)).astype(f32)

    return {
        'num_heads': num_heads,
        'ln1_g': (jnp.ones((num_layers, 1, hidden), f32)
                  + nrm(keys[0], (num_layers, 1, hidden))),
        'ln1_b': nrm(keys[1], (num_layers, 1, hidden)),
        'wq': nrm(keys[2], (num_layers, hidden, hidden)),
        'wk': nrm(keys[3], (num_layers, hidden, hidden)),
        'wv': nrm(keys[4], (num_layers, hidden, hidden)),
        'wo': nrm(keys[5], (num_layers, hidden, hidden)),
        'ln2_g': (jnp.ones((num_layers, 1, hidden), f32)
                  + nrm(keys[6], (num_layers, 1, hidden))),
        'ln2_b': nrm(keys[7], (num_layers, 1, hidden)),
        'w1': nrm(keys[8], (num_layers, hidden, filter_size)),
        'b1': nrm(keys[9], (num_layers, 1, filter_size)),
        'w2': nrm(keys[10], (num_layers, filter_size, hidden)),
        'b2': nrm(keys[11], (num_layers, 1, hidden)),
        'lnf_g': jnp.ones((1, hidden), f32),
        'lnf_b': jnp.zeros((1, hidden), f32),
    }


def reference_forward(params, x, attention_bias, num_heads):
    """Pure-JAX (f32) reference mirroring the PyTorch EncoderStack forward."""
    def ln(v, g, b):
        mu = v.mean(-1, keepdims=True)
        var = ((v - mu) ** 2).mean(-1, keepdims=True)
        return (v - mu) / jnp.sqrt(var + _EPS) * g + b

    B, L, H = x.shape
    dh = H // num_heads
    NL = params['wq'].shape[0]

    def split(t):
        return t.reshape(B, L, num_heads, dh).transpose(0, 2, 1, 3)

    for n in range(NL):
        y = ln(x, params['ln1_g'][n, 0], params['ln1_b'][n, 0])
        q = split(y @ params['wq'][n]) * dh ** -0.5
        k = split(y @ params['wk'][n])
        v = split(y @ params['wv'][n])
        logits = jnp.einsum('bnqd,bnkd->bnqk', q, k) + attention_bias
        w = jax.nn.softmax(logits, axis=-1)
        ctx = jnp.einsum('bnqk,bnkd->bnqd', w, v)
        ctx = ctx.transpose(0, 2, 1, 3).reshape(B, L, H)
        x = x + ctx @ params['wo'][n]
        y = ln(x, params['ln2_g'][n, 0], params['ln2_b'][n, 0])
        hmid = jax.nn.relu(y @ params['w1'][n] + params['b1'][n, 0])
        x = x + hmid @ params['w2'][n] + params['b2'][n, 0]
    return ln(x, params['lnf_g'][0], params['lnf_b'][0])


if __name__ == "__main__":
    # small shapes consistent with the module's forward
    # (production shapes should keep H a multiple of 128 for lane-dense vregs)
    B, L, H, NUM_HEADS, FILTER, NUM_LAYERS = 2, 8, 32, 4, 64, 2

    key = jax.random.PRNGKey(0)
    kp, kx = jax.random.split(key)
    params = init_params(kp, H, NUM_LAYERS, NUM_HEADS, FILTER)

    encoder_inputs = jax.random.normal(kx, (B, L, H), jnp.float32)
    inputs_padding = jnp.zeros((B, L), jnp.float32).at[1, L - 2:].set(1.0)
    attention_bias = (inputs_padding * -1e9).reshape(B, 1, 1, L)

    out = encoder_stack(params, encoder_inputs, attention_bias,
                        inputs_padding, training=False)
    out = jax.block_until_ready(out)

    # Reference in f32 using the same bf16-rounded weights the kernel streams,
    # so the comparison isolates the (expected) bf16-matmul rounding.
    ref_params = dict(params)
    for name in ('wq', 'wk', 'wv', 'wo', 'w1', 'w2'):
        ref_params[name] = params[name].astype(jnp.bfloat16).astype(jnp.float32)
    ref = reference_forward(ref_params, encoder_inputs, attention_bias, NUM_HEADS)

    np.testing.assert_allclose(np.asarray(out), np.asarray(ref),
                               rtol=2e-2, atol=2e-2)
    print("KERNEL_OK")
</pallas_src>

<mosaic_0001>
module attributes {stable_mosaic.version = 11 : i64} {
  func.func @kernel(%arg0: i32, %arg1: i32, %arg2: memref<2x8x32xf32, #tpu.memory_space<vmem>>, %arg3: memref<2x1x8xf32, #tpu.memory_space<vmem>>, %arg4: memref<1x1x32xf32, #tpu.memory_space<vmem>>, %arg5: memref<1x1x32xf32, #tpu.memory_space<vmem>>, %arg6: memref<1x32x32xbf16, #tpu.memory_space<vmem>>, %arg7: memref<1x32x32xbf16, #tpu.memory_space<vmem>>, %arg8: memref<1x32x32xbf16, #tpu.memory_space<vmem>>, %arg9: memref<1x32x32xbf16, #tpu.memory_space<vmem>>, %arg10: memref<1x1x32xf32, #tpu.memory_space<vmem>>, %arg11: memref<1x1x32xf32, #tpu.memory_space<vmem>>, %arg12: memref<1x32x64xbf16, #tpu.memory_space<vmem>>, %arg13: memref<1x1x64xf32, #tpu.memory_space<vmem>>, %arg14: memref<1x64x32xbf16, #tpu.memory_space<vmem>>, %arg15: memref<1x1x32xf32, #tpu.memory_space<vmem>>, %arg16: memref<1x32xf32, #tpu.memory_space<vmem>>, %arg17: memref<1x32xf32, #tpu.memory_space<vmem>>, %arg18: memref<2x8x32xf32, #tpu.memory_space<vmem>>, %arg19: memref<2x8x32xbf16, #tpu.memory_space<vmem>>) attributes {dimension_semantics = [#tpu.dimension_semantics<parallel>, #tpu.dimension_semantics<arbitrary>], iteration_bounds = array<i64: 1, 2>, scalar_prefetch = 0 : i64, scratch_operands = 1 : i64, tpu.core_type = #tpu.core_type<tc>, window_params = [{transform_indices = @transform_0, window_bounds = array<i64: 2, 8, 32>}, {transform_indices = @transform_1, window_bounds = array<i64: 2, 1, 8>}, {transform_indices = @transform_2, window_bounds = array<i64: 1, 1, 32>}, {transform_indices = @transform_3, window_bounds = array<i64: 1, 1, 32>}, {transform_indices = @transform_4, window_bounds = array<i64: 1, 32, 32>}, {transform_indices = @transform_5, window_bounds = array<i64: 1, 32, 32>}, {transform_indices = @transform_6, window_bounds = array<i64: 1, 32, 32>}, {transform_indices = @transform_7, window_bounds = array<i64: 1, 32, 32>}, {transform_indices = @transform_8, window_bounds = array<i64: 1, 1, 32>}, {transform_indices = @transform_9, window_bounds = array<i64: 1, 1, 32>}, {transform_indices = @transform_10, window_bounds = array<i64: 1, 32, 64>}, {transform_indices = @transform_11, window_bounds = array<i64: 1, 1, 64>}, {transform_indices = @transform_12, window_bounds = array<i64: 1, 64, 32>}, {transform_indices = @transform_13, window_bounds = array<i64: 1, 1, 32>}, {pipeline_mode = #tpu.pipeline_mode<synchronous>, transform_indices = @transform_14, window_bounds = array<i64: 1, 32>}, {pipeline_mode = #tpu.pipeline_mode<synchronous>, transform_indices = @transform_15, window_bounds = array<i64: 1, 32>}, {transform_indices = @transform_16, window_bounds = array<i64: 2, 8, 32>}]} {
    %c0_i32 = arith.constant 0 : i32
    %0 = arith.cmpi eq, %arg1, %c0_i32 : i32
    %1 = arith.extui %0 : i1 to i32
    %c0_i32_0 = arith.constant 0 : i32
    %2 = arith.cmpi ne, %1, %c0_i32_0 : i32
    scf.if %2 {
      %c0_96 = arith.constant 0 : index
      %c0_97 = arith.constant 0 : index
      %c0_98 = arith.constant 0 : index
      %206 = vector.load %arg2[%c0_96, %c0_97, %c0_98] : memref<2x8x32xf32, #tpu.memory_space<vmem>>, vector<2x8x32xf32>
      %c0_99 = arith.constant 0 : index
      %c0_100 = arith.constant 0 : index
      %c0_101 = arith.constant 0 : index
      %207 = vector.load %arg18[%c0_99, %c0_100, %c0_101] : memref<2x8x32xf32, #tpu.memory_space<vmem>>, vector<2x8x32xf32>
      tpu.vector_store %arg18[%c0_99, %c0_100, %c0_101], %206 {strides = array<i32>} : memref<2x8x32xf32, #tpu.memory_space<vmem>>, vector<2x8x32xf32>,
    } else {
    }
    %c0 = arith.constant 0 : index
    %c0_1 = arith.constant 0 : index
    %c0_2 = arith.constant 0 : index
    %3 = vector.load %arg18[%c0, %c0_1, %c0_2] : memref<2x8x32xf32, #tpu.memory_space<vmem>>, vector<2x8x32xf32>
    %c0_3 = arith.constant 0 : index
    %c0_4 = arith.constant 0 : index
    %c0_5 = arith.constant 0 : index
    %4 = vector.load %arg3[%c0_3, %c0_4, %c0_5] : memref<2x1x8xf32, #tpu.memory_space<vmem>>, vector<2x1x8xf32>
    %c0_6 = arith.constant 0 : index
    %c0_7 = arith.constant 0 : index
    %c0_8 = arith.constant 0 : index
    %5 = vector.load %arg4[%c0_6, %c0_7, %c0_8] : memref<1x1x32xf32, #tpu.memory_space<vmem>>, vector<1x1x32xf32>
    %6 = vector.shape_cast %5 : vector<1x1x32xf32> to vector<1x32xf32>
    %c0_9 = arith.constant 0 : index
    %c0_10 = arith.constant 0 : index
    %c0_11 = arith.constant 0 : index
    %7 = vector.load %arg5[%c0_9, %c0_10, %c0_11] : memref<1x1x32xf32, #tpu.memory_space<vmem>>, vector<1x1x32xf32>
    %8 = vector.shape_cast %7 : vector<1x1x32xf32> to vector<1x32xf32>
    %cst = arith.constant dense<0.000000e+00> : vector<2x8xf32>
    %9 = vector.multi_reduction <add>, %3, %cst [2] : vector<2x8x32xf32> to vector<2x8xf32>
    %10 = vector.shape_cast %9 : vector<2x8xf32> to vector<2x8x1xf32>
    %cst_12 = arith.constant 3.200000e+01 : f32
    %11 = vector.broadcast %cst_12 : f32 to vector<2x8x1xf32>
    %12 = arith.divf %10, %11 : vector<2x8x1xf32>
    %13 = arith.mulf %3, %3 : vector<2x8x32xf32>
    %cst_13 = arith.constant dense<0.000000e+00> : vector<2x8xf32>
    %14 = vector.multi_reduction <add>, %13, %cst_13 [2] : vector<2x8x32xf32> to vector<2x8xf32>
    %15 = vector.shape_cast %14 : vector<2x8xf32> to vector<2x8x1xf32>
    %cst_14 = arith.constant 3.200000e+01 : f32
    %16 = vector.broadcast %cst_14 : f32 to vector<2x8x1xf32>
    %17 = arith.divf %15, %16 : vector<2x8x1xf32>
    %18 = arith.mulf %12, %12 : vector<2x8x1xf32>
    %19 = arith.subf %17, %18 : vector<2x8x1xf32>
    %cst_15 = arith.constant 0.000000e+00 : f32
    %20 = vector.broadcast %cst_15 : f32 to vector<2x8x1xf32>
    %21 = arith.maximumf %19, %20 : vector<2x8x1xf32>
    %22 = vector.broadcast %12 : vector<2x8x1xf32> to vector<2x8x32xf32>
    %23 = arith.subf %3, %22 : vector<2x8x32xf32>
    %cst_16 = arith.constant 9.99999974E-6 : f32
    %24 = vector.broadcast %cst_16 : f32 to vector<2x8x1xf32>
    %25 = arith.addf %21, %24 : vector<2x8x1xf32>
    %26 = math.rsqrt %25 : vector<2x8x1xf32>
    %27 = vector.broadcast %26 : vector<2x8x1xf32> to vector<2x8x32xf32>
    %28 = arith.mulf %23, %27 : vector<2x8x32xf32>
    %29 = vector.shape_cast %6 : vector<1x32xf32> to vector<1x1x32xf32>
    %30 = vector.broadcast %29 : vector<1x1x32xf32> to vector<2x8x32xf32>
    %31 = arith.mulf %28, %30 : vector<2x8x32xf32>
    %32 = vector.shape_cast %8 : vector<1x32xf32> to vector<1x1x32xf32>
    %33 = vector.broadcast %32 : vector<1x1x32xf32> to vector<2x8x32xf32>
    %34 = arith.addf %31, %33 : vector<2x8x32xf32>
    %35 = arith.truncf %34 : vector<2x8x32xf32> to vector<2x8x32xbf16>
    %36 = vector.shape_cast %35 : vector<2x8x32xbf16> to vector<16x32xbf16>
    %c0_17 = arith.constant 0 : index
    %c0_18 = arith.constant 0 : index
    %c0_19 = arith.constant 0 : index
    %37 = vector.load %arg6[%c0_17, %c0_18, %c0_19] : memref<1x32x32xbf16, #tpu.memory_space<vmem>>, vector<1x32x32xbf16>
    %38 = vector.shape_cast %37 : vector<1x32x32xbf16> to vector<32x32xbf16>
    %cst_20 = arith.constant dense<0.000000e+00> : vector<16x32xf32>
    %39 = tpu.matmul %36, %38, %cst_20 {dimension_numbers = #tpu.dot_dimension_numbers<[1], [0], [0], [1], [0, 0, 1, 1], [], []>} : vector<16x32xbf16>, vector<32x32xbf16>, vector<16x32xf32> -> vector<16x32xf32>
    %cst_21 = arith.constant 0.353553385 : f32
    %40 = vector.broadcast %cst_21 : f32 to vector<16x32xf32>
    %41 = arith.mulf %39, %40 : vector<16x32xf32>
    %42 = arith.truncf %41 : vector<16x32xf32> to vector<16x32xbf16>
    %43 = vector.shape_cast %42 : vector<16x32xbf16> to vector<2x8x32xbf16>
    %c0_22 = arith.constant 0 : index
    %c0_23 = arith.constant 0 : index
    %c0_24 = arith.constant 0 : index
    %44 = vector.load %arg19[%c0_22, %c0_23, %c0_24] : memref<2x8x32xbf16, #tpu.memory_space<vmem>>, vector<2x8x32xbf16>
    tpu.vector_store %arg19[%c0_22, %c0_23, %c0_24], %43 {strides = array<i32>} : memref<2x8x32xbf16, #tpu.memory_space<vmem>>, vector<2x8x32xbf16>,
    %c0_25 = arith.constant 0 : index
    %c0_26 = arith.constant 0 : index
    %c0_27 = arith.constant 0 : index
    %45 = vector.load %arg7[%c0_25, %c0_26, %c0_27] : memref<1x32x32xbf16, #tpu.memory_space<vmem>>, vector<1x32x32xbf16>
    %46 = vector.shape_cast %45 : vector<1x32x32xbf16> to vector<32x32xbf16>
    %cst_28 = arith.constant dense<0.000000e+00> : vector<16x32xf32>
    %47 = tpu.matmul %36, %46, %cst_28 {dimension_numbers = #tpu.dot_dimension_numbers<[1], [0], [0], [1], [0, 0, 1, 1], [], []>} : vector<16x32xbf16>, vector<32x32xbf16>, vector<16x32xf32> -> vector<16x32xf32>
    %48 = arith.truncf %47 : vector<16x32xf32> to vector<16x32xbf16>
    %c0_29 = arith.constant 0 : index
    %c0_30 = arith.constant 0 : index
    %c0_31 = arith.constant 0 : index
    %49 = vector.load %arg8[%c0_29, %c0_30, %c0_31] : memref<1x32x32xbf16, #tpu.memory_space<vmem>>, vector<1x32x32xbf16>
    %50 = vector.shape_cast %49 : vector<1x32x32xbf16> to vector<32x32xbf16>
    %cst_32 = arith.constant dense<0.000000e+00> : vector<16x32xf32>
    %51 = tpu.matmul %36, %50, %cst_32 {dimension_numbers = #tpu.dot_dimension_numbers<[1], [0], [0], [1], [0, 0, 1, 1], [], []>} : vector<16x32xbf16>, vector<32x32xbf16>, vector<16x32xf32> -> vector<16x32xf32>
    %52 = arith.truncf %51 : vector<16x32xf32> to vector<16x32xbf16>
    %53 = vector.shape_cast %48 : vector<16x32xbf16> to vector<2x8x32xbf16>
    %54 = vector.shape_cast %52 : vector<16x32xbf16> to vector<2x8x32xbf16>
    %c0_33 = arith.constant 0 : index
    %c0_34 = arith.constant 0 : index
    %c0_35 = arith.constant 0 : index
    %55 = vector.load %arg9[%c0_33, %c0_34, %c0_35] : memref<1x32x32xbf16, #tpu.memory_space<vmem>>, vector<1x32x32xbf16>
    %56 = vector.shape_cast %55 : vector<1x32x32xbf16> to vector<32x32xbf16>
    %c0_i32_36 = arith.constant 0 : i32
    %c8_i32 = arith.constant 8 : i32
    %57 = arith.muli %c0_i32_36, %c8_i32 : i32
    %58 = tpu.assume_multiple %57, 8 : i32
    %c0_37 = arith.constant 0 : index
    %59 = arith.index_cast %58 : i32 to index
    %c0_38 = arith.constant 0 : index
    %60 = vector.load %arg18[%c0_37, %59, %c0_38] : memref<2x8x32xf32, #tpu.memory_space<vmem>>, vector<2x8x32xf32>
    %c0_39 = arith.constant 0 : index
    %61 = arith.index_cast %58 : i32 to index
    %c0_40 = arith.constant 0 : index
    %62 = vector.load %arg19[%c0_39, %61, %c0_40] : memref<2x8x32xbf16, #tpu.memory_space<vmem>>, vector<2x8x32xbf16>
    %63 = vector.extract_strided_slice %62 {offsets = [0, 0, 0], sizes = [2, 8, 8], strides = [1, 1, 1]} : vector<2x8x32xbf16> to vector<2x8x8xbf16>
    %64 = vector.extract_strided_slice %53 {offsets = [0, 0, 0], sizes = [2, 8, 8], strides = [1, 1, 1]} : vector<2x8x32xbf16> to vector<2x8x8xbf16>
    "tpu.trace_start"() <{level = 10 : i32, message = "bqd,bkd->bqk"}> : () -> ()
    %cst_41 = arith.constant dense<0.000000e+00> : vector<2x8x8xf32>
    %65 = tpu.matmul %63, %64, %cst_41 {dimension_numbers = #tpu.dot_dimension_numbers<[2], [2], [1], [1], [0, 0, 0, 1, 1, 1], [0], [0]>} : vector<2x8x8xbf16>, vector<2x8x8xbf16>, vector<2x8x8xf32> -> vector<2x8x8xf32>
    "tpu.trace_stop"() : () -> ()
    %66 = vector.broadcast %4 : vector<2x1x8xf32> to vector<2x8x8xf32>
    %67 = arith.addf %65, %66 : vector<2x8x8xf32>
    %cst_42 = arith.constant dense<0xFF800000> : vector<2x8xf32>
    %68 = vector.multi_reduction <maximumf>, %67, %cst_42 [2] : vector<2x8x8xf32> to vector<2x8xf32>
    %69 = vector.shape_cast %68 : vector<2x8xf32> to vector<2x8x1xf32>
    %70 = vector.broadcast %69 : vector<2x8x1xf32> to vector<2x8x8xf32>
    %71 = arith.subf %67, %70 : vector<2x8x8xf32>
    %72 = math.exp %71 : vector<2x8x8xf32>
    %cst_43 = arith.constant dense<0.000000e+00> : vector<2x8xf32>
    %73 = vector.multi_reduction <add>, %72, %cst_43 [2] : vector<2x8x8xf32> to vector<2x8xf32>
    %74 = vector.shape_cast %73 : vector<2x8xf32> to vector<2x8x1xf32>
    %75 = tpu.reciprocal %74 {approx = true} : vector<2x8x1xf32> -> vector<2x8x1xf32>
    %76 = vector.broadcast %75 : vector<2x8x1xf32> to vector<2x8x8xf32>
    %77 = arith.mulf %72, %76 : vector<2x8x8xf32>
    %78 = arith.truncf %77 : vector<2x8x8xf32> to vector<2x8x8xbf16>
    %79 = vector.extract_strided_slice %54 {offsets = [0, 0, 0], sizes = [2, 8, 8], strides = [1, 1, 1]} : vector<2x8x32xbf16> to vector<2x8x8xbf16>
    "tpu.trace_start"() <{level = 10 : i32, message = "bqk,bkd->bqd"}> : () -> ()
    %cst_44 = arith.constant dense<0.000000e+00> : vector<2x8x8xf32>
    %80 = tpu.matmul %78, %79, %cst_44 {dimension_numbers = #tpu.dot_dimension_numbers<[2], [1], [1], [2], [0, 0, 0, 1, 1, 2], [0], [0]>} : vector<2x8x8xbf16>, vector<2x8x8xbf16>, vector<2x8x8xf32> -> vector<2x8x8xf32>
    "tpu.trace_stop"() : () -> ()
    %81 = arith.truncf %80 : vector<2x8x8xf32> to vector<2x8x8xbf16>
    %82 = vector.extract_strided_slice %62 {offsets = [0, 0, 8], sizes = [2, 8, 8], strides = [1, 1, 1]} : vector<2x8x32xbf16> to vector<2x8x8xbf16>
    %83 = vector.extract_strided_slice %53 {offsets = [0, 0, 8], sizes = [2, 8, 8], strides = [1, 1, 1]} : vector<2x8x32xbf16> to vector<2x8x8xbf16>
    "tpu.trace_start"() <{level = 10 : i32, message = "bqd,bkd->bqk"}> : () -> ()
    %cst_45 = arith.constant dense<0.000000e+00> : vector<2x8x8xf32>
    %84 = tpu.matmul %82, %83, %cst_45 {dimension_numbers = #tpu.dot_dimension_numbers<[2], [2], [1], [1], [0, 0, 0, 1, 1, 1], [0], [0]>} : vector<2x8x8xbf16>, vector<2x8x8xbf16>, vector<2x8x8xf32> -> vector<2x8x8xf32>
    "tpu.trace_stop"() : () -> ()
    %85 = vector.broadcast %4 : vector<2x1x8xf32> to vector<2x8x8xf32>
    %86 = arith.addf %84, %85 : vector<2x8x8xf32>
    %cst_46 = arith.constant dense<0xFF800000> : vector<2x8xf32>
    %87 = vector.multi_reduction <maximumf>, %86, %cst_46 [2] : vector<2x8x8xf32> to vector<2x8xf32>
    %88 = vector.shape_cast %87 : vector<2x8xf32> to vector<2x8x1xf32>
    %89 = vector.broadcast %88 : vector<2x8x1xf32> to vector<2x8x8xf32>
    %90 = arith.subf %86, %89 : vector<2x8x8xf32>
    %91 = math.exp %90 : vector<2x8x8xf32>
    %cst_47 = arith.constant dense<0.000000e+00> : vector<2x8xf32>
    %92 = vector.multi_reduction <add>, %91, %cst_47 [2] : vector<2x8x8xf32> to vector<2x8xf32>
    %93 = vector.shape_cast %92 : vector<2x8xf32> to vector<2x8x1xf32>
    %94 = tpu.reciprocal %93 {approx = true} : vector<2x8x1xf32> -> vector<2x8x1xf32>
    %95 = vector.broadcast %94 : vector<2x8x1xf32> to vector<2x8x8xf32>
    %96 = arith.mulf %91, %95 : vector<2x8x8xf32>
    %97 = arith.truncf %96 : vector<2x8x8xf32> to vector<2x8x8xbf16>
    %98 = vector.extract_strided_slice %54 {offsets = [0, 0, 8], sizes = [2, 8, 8], strides = [1, 1, 1]} : vector<2x8x32xbf16> to vector<2x8x8xbf16>
    "tpu.trace_start"() <{level = 10 : i32, message = "bqk,bkd->bqd"}> : () -> ()
    %cst_48 = arith.constant dense<0.000000e+00> : vector<2x8x8xf32>
    %99 = tpu.matmul %97, %98, %cst_48 {dimension_numbers = #tpu.dot_dimension_numbers<[2], [1], [1], [2], [0, 0, 0, 1, 1, 2], [0], [0]>} : vector<2x8x8xbf16>, vector<2x8x8xbf16>, vector<2x8x8xf32> -> vector<2x8x8xf32>
    "tpu.trace_stop"() : () -> ()
    %100 = arith.truncf %99 : vector<2x8x8xf32> to vector<2x8x8xbf16>
    %101 = vector.extract_strided_slice %62 {offsets = [0, 0, 16], sizes = [2, 8, 8], strides = [1, 1, 1]} : vector<2x8x32xbf16> to vector<2x8x8xbf16>
    %102 = vector.extract_strided_slice %53 {offsets = [0, 0, 16], sizes = [2, 8, 8], strides = [1, 1, 1]} : vector<2x8x32xbf16> to vector<2x8x8xbf16>
    "tpu.trace_start"() <{level = 10 : i32, message = "bqd,bkd->bqk"}> : () -> ()
    %cst_49 = arith.constant dense<0.000000e+00> : vector<2x8x8xf32>
    %103 = tpu.matmul %101, %102, %cst_49 {dimension_numbers = #tpu.dot_dimension_numbers<[2], [2], [1], [1], [0, 0, 0, 1, 1, 1], [0], [0]>} : vector<2x8x8xbf16>, vector<2x8x8xbf16>, vector<2x8x8xf32> -> vector<2x8x8xf32>
    "tpu.trace_stop"() : () -> ()
    %104 = vector.broadcast %4 : vector<2x1x8xf32> to vector<2x8x8xf32>
    %105 = arith.addf %103, %104 : vector<2x8x8xf32>
    %cst_50 = arith.constant dense<0xFF800000> : vector<2x8xf32>
    %106 = vector.multi_reduction <maximumf>, %105, %cst_50 [2] : vector<2x8x8xf32> to vector<2x8xf32>
    %107 = vector.shape_cast %106 : vector<2x8xf32> to vector<2x8x1xf32>
    %108 = vector.broadcast %107 : vector<2x8x1xf32> to vector<2x8x8xf32>
    %109 = arith.subf %105, %108 : vector<2x8x8xf32>
    %110 = math.exp %109 : vector<2x8x8xf32>
    %cst_51 = arith.constant dense<0.000000e+00> : vector<2x8xf32>
    %111 = vector.multi_reduction <add>, %110, %cst_51 [2] : vector<2x8x8xf32> to vector<2x8xf32>
    %112 = vector.shape_cast %111 : vector<2x8xf32> to vector<2x8x1xf32>
    %113 = tpu.reciprocal %112 {approx = true} : vector<2x8x1xf32> -> vector<2x8x1xf32>
    %114 = vector.broadcast %113 : vector<2x8x1xf32> to vector<2x8x8xf32>
    %115 = arith.mulf %110, %114 : vector<2x8x8xf32>
    %116 = arith.truncf %115 : vector<2x8x8xf32> to vector<2x8x8xbf16>
    %117 = vector.extract_strided_slice %54 {offsets = [0, 0, 16], sizes = [2, 8, 8], strides = [1, 1, 1]} : vector<2x8x32xbf16> to vector<2x8x8xbf16>
    "tpu.trace_start"() <{level = 10 : i32, message = "bqk,bkd->bqd"}> : () -> ()
    %cst_52 = arith.constant dense<0.000000e+00> : vector<2x8x8xf32>
    %118 = tpu.matmul %116, %117, %cst_52 {dimension_numbers = #tpu.dot_dimension_numbers<[2], [1], [1], [2], [0, 0, 0, 1, 1, 2], [0], [0]>} : vector<2x8x8xbf16>, vector<2x8x8xbf16>, vector<2x8x8xf32> -> vector<2x8x8xf32>
    "tpu.trace_stop"() : () -> ()
    %119 = arith.truncf %118 : vector<2x8x8xf32> to vector<2x8x8xbf16>
    %120 = vector.extract_strided_slice %62 {offsets = [0, 0, 24], sizes = [2, 8, 8], strides = [1, 1, 1]} : vector<2x8x32xbf16> to vector<2x8x8xbf16>
    %121 = vector.extract_strided_slice %53 {offsets = [0, 0, 24], sizes = [2, 8, 8], strides = [1, 1, 1]} : vector<2x8x32xbf16> to vector<2x8x8xbf16>
    "tpu.trace_start"() <{level = 10 : i32, message = "bqd,bkd->bqk"}> : () -> ()
    %cst_53 = arith.constant dense<0.000000e+00> : vector<2x8x8xf32>
    %122 = tpu.matmul %120, %121, %cst_53 {dimension_numbers = #tpu.dot_dimension_numbers<[2], [2], [1], [1], [0, 0, 0, 1, 1, 1], [0], [0]>} : vector<2x8x8xbf16>, vector<2x8x8xbf16>, vector<2x8x8xf32> -> vector<2x8x8xf32>
    "tpu.trace_stop"() : () -> ()
    %123 = vector.broadcast %4 : vector<2x1x8xf32> to vector<2x8x8xf32>
    %124 = arith.addf %122, %123 : vector<2x8x8xf32>
    %cst_54 = arith.constant dense<0xFF800000> : vector<2x8xf32>
    %125 = vector.multi_reduction <maximumf>, %124, %cst_54 [2] : vector<2x8x8xf32> to vector<2x8xf32>
    %126 = vector.shape_cast %125 : vector<2x8xf32> to vector<2x8x1xf32>
    %127 = vector.broadcast %126 : vector<2x8x1xf32> to vector<2x8x8xf32>
    %128 = arith.subf %124, %127 : vector<2x8x8xf32>
    %129 = math.exp %128 : vector<2x8x8xf32>
    %cst_55 = arith.constant dense<0.000000e+00> : vector<2x8xf32>
    %130 = vector.multi_reduction <add>, %129, %cst_55 [2] : vector<2x8x8xf32> to vector<2x8xf32>
    %131 = vector.shape_cast %130 : vector<2x8xf32> to vector<2x8x1xf32>
    %132 = tpu.reciprocal %131 {approx = true} : vector<2x8x1xf32> -> vector<2x8x1xf32>
    %133 = vector.broadcast %132 : vector<2x8x1xf32> to vector<2x8x8xf32>
    %134 = arith.mulf %129, %133 : vector<2x8x8xf32>
    %135 = arith.truncf %134 : vector<2x8x8xf32> to vector<2x8x8xbf16>
    %136 = vector.extract_strided_slice %54 {offsets = [0, 0, 24], sizes = [2, 8, 8], strides = [1, 1, 1]} : vector<2x8x32xbf16> to vector<2x8x8xbf16>
    "tpu.trace_start"() <{level = 10 : i32, message = "bqk,bkd->bqd"}> : () -> ()
    %cst_56 = arith.constant dense<0.000000e+00> : vector<2x8x8xf32>
    %137 = tpu.matmul %135, %136, %cst_56 {dimension_numbers = #tpu.dot_dimension_numbers<[2], [1], [1], [2], [0, 0, 0, 1, 1, 2], [0], [0]>} : vector<2x8x8xbf16>, vector<2x8x8xbf16>, vector<2x8x8xf32> -> vector<2x8x8xf32>
    "tpu.trace_stop"() : () -> ()
    %138 = arith.truncf %137 : vector<2x8x8xf32> to vector<2x8x8xbf16>
    %139 = tpu.concatenate %81, %100, %119, %138 in 2 : vector<2x8x8xbf16>, vector<2x8x8xbf16>, vector<2x8x8xbf16>, vector<2x8x8xbf16> -> vector<2x8x32xbf16>
    %140 = vector.shape_cast %139 : vector<2x8x32xbf16> to vector<16x32xbf16>
    %cst_57 = arith.constant dense<0.000000e+00> : vector<16x32xf32>
    %141 = tpu.matmul %140, %56, %cst_57 {dimension_numbers = #tpu.dot_dimension_numbers<[1], [0], [0], [1], [0, 0, 1, 1], [], []>} : vector<16x32xbf16>, vector<32x32xbf16>, vector<16x32xf32> -> vector<16x32xf32>
    %142 = vector.shape_cast %141 : vector<16x32xf32> to vector<2x8x32xf32>
    %143 = arith.addf %60, %142 : vector<2x8x32xf32>
    %c0_58 = arith.constant 0 : index
    %144 = arith.index_cast %58 : i32 to index
    %c0_59 = arith.constant 0 : index
    %145 = vector.load %arg18[%c0_58, %144, %c0_59] : memref<2x8x32xf32, #tpu.memory_space<vmem>>, vector<2x8x32xf32>
    tpu.vector_store %arg18[%c0_58, %144, %c0_59], %143 {strides = array<i32>} : memref<2x8x32xf32, #tpu.memory_space<vmem>>, vector<2x8x32xf32>,
    %c1_i32 = arith.constant 1 : i32
    %c0_60 = arith.constant 0 : index
    %c0_61 = arith.constant 0 : index
    %c0_62 = arith.constant 0 : index
    %146 = vector.load %arg12[%c0_60, %c0_61, %c0_62] : memref<1x32x64xbf16, #tpu.memory_space<vmem>>, vector<1x32x64xbf16>
    %147 = vector.shape_cast %146 : vector<1x32x64xbf16> to vector<32x64xbf16>
    %c0_63 = arith.constant 0 : index
    %c0_64 = arith.constant 0 : index
    %c0_65 = arith.constant 0 : index
    %148 = vector.load %arg13[%c0_63, %c0_64, %c0_65] : memref<1x1x64xf32, #tpu.memory_space<vmem>>, vector<1x1x64xf32>
    %149 = vector.shape_cast %148 : vector<1x1x64xf32> to vector<1x64xf32>
    %c0_66 = arith.constant 0 : index
    %c0_67 = arith.constant 0 : index
    %c0_68 = arith.constant 0 : index
    %150 = vector.load %arg14[%c0_66, %c0_67, %c0_68] : memref<1x64x32xbf16, #tpu.memory_space<vmem>>, vector<1x64x32xbf16>
    %151 = vector.shape_cast %150 : vector<1x64x32xbf16> to vector<64x32xbf16>
    %c0_69 = arith.constant 0 : index
    %c0_70 = arith.constant 0 : index
    %c0_71 = arith.constant 0 : index
    %152 = vector.load %arg15[%c0_69, %c0_70, %c0_71] : memref<1x1x32xf32, #tpu.memory_space<vmem>>, vector<1x1x32xf32>
    %153 = vector.shape_cast %152 : vector<1x1x32xf32> to vector<1x32xf32>
    %c0_72 = arith.constant 0 : index
    %c0_73 = arith.constant 0 : index
    %c0_74 = arith.constant 0 : index
    %154 = vector.load %arg10[%c0_72, %c0_73, %c0_74] : memref<1x1x32xf32, #tpu.memory_space<vmem>>, vector<1x1x32xf32>
    %155 = vector.shape_cast %154 : vector<1x1x32xf32> to vector<1x32xf32>
    %c0_75 = arith.constant 0 : index
    %c0_76 = arith.constant 0 : index
    %c0_77 = arith.constant 0 : index
    %156 = vector.load %arg11[%c0_75, %c0_76, %c0_77] : memref<1x1x32xf32, #tpu.memory_space<vmem>>, vector<1x1x32xf32>
    %157 = vector.shape_cast %156 : vector<1x1x32xf32> to vector<1x32xf32>
    %c0_i32_78 = arith.constant 0 : i32
    %c8_i32_79 = arith.constant 8 : i32
    %158 = arith.muli %c0_i32_78, %c8_i32_79 : i32
    %159 = tpu.assume_multiple %158, 8 : i32
    %c0_80 = arith.constant 0 : index
    %160 = arith.index_cast %159 : i32 to index
    %c0_81 = arith.constant 0 : index
    %161 = vector.load %arg18[%c0_80, %160, %c0_81] : memref<2x8x32xf32, #tpu.memory_space<vmem>>, vector<2x8x32xf32>
    %cst_82 = arith.constant dense<0.000000e+00> : vector<2x8xf32>
    %162 = vector.multi_reduction <add>, %161, %cst_82 [2] : vector<2x8x32xf32> to vector<2x8xf32>
    %163 = vector.shape_cast %162 : vector<2x8xf32> to vector<2x8x1xf32>
    %cst_83 = arith.constant 3.200000e+01 : f32
    %164 = vector.broadcast %cst_83 : f32 to vector<2x8x1xf32>
    %165 = arith.divf %163, %164 : vector<2x8x1xf32>
    %166 = arith.mulf %161, %161 : vector<2x8x32xf32>
    %cst_84 = arith.constant dense<0.000000e+00> : vector<2x8xf32>
    %167 = vector.multi_reduction <add>, %166, %cst_84 [2] : vector<2x8x32xf32> to vector<2x8xf32>
    %168 = vector.shape_cast %167 : vector<2x8xf32> to vector<2x8x1xf32>
    %cst_85 = arith.constant 3.200000e+01 : f32
    %169 = vector.broadcast %cst_85 : f32 to vector<2x8x1xf32>
    %170 = arith.divf %168, %169 : vector<2x8x1xf32>
    %171 = arith.mulf %165, %165 : vector<2x8x1xf32>
    %172 = arith.subf %170, %171 : vector<2x8x1xf32>
    %cst_86 = arith.constant 0.000000e+00 : f32
    %173 = vector.broadcast %cst_86 : f32 to vector<2x8x1xf32>
    %174 = arith.maximumf %172, %173 : vector<2x8x1xf32>
    %175 = vector.broadcast %165 : vector<2x8x1xf32> to vector<2x8x32xf32>
    %176 = arith.subf %161, %175 : vector<2x8x32xf32>
    %cst_87 = arith.constant 9.99999974E-6 : f32
    %177 = vector.broadcast %cst_87 : f32 to vector<2x8x1xf32>
    %178 = arith.addf %174, %177 : vector<2x8x1xf32>
    %179 = math.rsqrt %178 : vector<2x8x1xf32>
    %180 = vector.broadcast %179 : vector<2x8x1xf32> to vector<2x8x32xf32>
    %181 = arith.mulf %176, %180 : vector<2x8x32xf32>
    %182 = vector.shape_cast %155 : vector<1x32xf32> to vector<1x1x32xf32>
    %183 = vector.broadcast %182 : vector<1x1x32xf32> to vector<2x8x32xf32>
    %184 = arith.mulf %181, %183 : vector<2x8x32xf32>
    %185 = vector.shape_cast %157 : vector<1x32xf32> to vector<1x1x32xf32>
    %186 = vector.broadcast %185 : vector<1x1x32xf32> to vector<2x8x32xf32>
    %187 = arith.addf %184, %186 : vector<2x8x32xf32>
    %188 = arith.truncf %187 : vector<2x8x32xf32> to vector<2x8x32xbf16>
    %189 = vector.shape_cast %188 : vector<2x8x32xbf16> to vector<16x32xbf16>
    %cst_88 = arith.constant dense<0.000000e+00> : vector<16x64xf32>
    %190 = tpu.matmul %189, %147, %cst_88 {dimension_numbers = #tpu.dot_dimension_numbers<[1], [0], [0], [1], [0, 0, 1, 1], [], []>} : vector<16x32xbf16>, vector<32x64xbf16>, vector<16x64xf32> -> vector<16x64xf32>
    %191 = vector.broadcast %149 : vector<1x64xf32> to vector<16x64xf32>
    %192 = arith.addf %190, %191 : vector<16x64xf32>
    %cst_89 = arith.constant 0.000000e+00 : f32
    %193 = vector.broadcast %cst_89 : f32 to vector<16x64xf32>
    %194 = arith.maximumf %192, %193 : vector<16x64xf32>
    %195 = arith.truncf %194 : vector<16x64xf32> to vector<16x64xbf16>
    %cst_90 = arith.constant dense<0.000000e+00> : vector<16x32xf32>
    %196 = tpu.matmul %195, %151, %cst_90 {dimension_numbers = #tpu.dot_dimension_numbers<[1], [0], [0], [1], [0, 0, 1, 1], [], []>} : vector<16x64xbf16>, vector<64x32xbf16>, vector<16x32xf32> -> vector<16x32xf32>
    %197 = vector.broadcast %153 : vector<1x32xf32> to vector<16x32xf32>
    %198 = arith.addf %196, %197 : vector<16x32xf32>
    %199 = vector.shape_cast %198 : vector<16x32xf32> to vector<2x8x32xf32>
    %200 = arith.addf %161, %199 : vector<2x8x32xf32>
    %c0_91 = arith.constant 0 : index
    %201 = arith.index_cast %159 : i32 to index
    %c0_92 = arith.constant 0 : index
    %202 = vector.load %arg18[%c0_91, %201, %c0_92] : memref<2x8x32xf32, #tpu.memory_space<vmem>>, vector<2x8x32xf32>
    tpu.vector_store %arg18[%c0_91, %201, %c0_92], %200 {strides = array<i32>} : memref<2x8x32xf32, #tpu.memory_space<vmem>>, vector<2x8x32xf32>,
    %c1_i32_93 = arith.constant 1 : i32
    %c1_i32_94 = arith.constant 1 : i32
    %203 = arith.cmpi eq, %arg1, %c1_i32_94 : i32
    %204 = arith.extui %203 : i1 to i32
    %c0_i32_95 = arith.constant 0 : i32
    %205 = arith.cmpi ne, %204, %c0_i32_95 : i32
    scf.if %205 {
      %c0_96 = arith.constant 0 : index
      %c0_97 = arith.constant 0 : index
      %c0_98 = arith.constant 0 : index
      %206 = vector.load %arg18[%c0_96, %c0_97, %c0_98] : memref<2x8x32xf32, #tpu.memory_space<vmem>>, vector<2x8x32xf32>
      %c0_99 = arith.constant 0 : index
      %c0_100 = arith.constant 0 : index
      %207 = vector.load %arg16[%c0_99, %c0_100] : memref<1x32xf32, #tpu.memory_space<vmem>>, vector<1x32xf32>
      %c0_101 = arith.constant 0 : index
      %c0_102 = arith.constant 0 : index
      %208 = vector.load %arg17[%c0_101, %c0_102] : memref<1x32xf32, #tpu.memory_space<vmem>>, vector<1x32xf32>
      %cst_103 = arith.constant dense<0.000000e+00> : vector<2x8xf32>
      %209 = vector.multi_reduction <add>, %206, %cst_103 [2] : vector<2x8x32xf32> to vector<2x8xf32>
      %210 = vector.shape_cast %209 : vector<2x8xf32> to vector<2x8x1xf32>
      %cst_104 = arith.constant 3.200000e+01 : f32
      %211 = vector.broadcast %cst_104 : f32 to vector<2x8x1xf32>
      %212 = arith.divf %210, %211 : vector<2x8x1xf32>
      %213 = arith.mulf %206, %206 : vector<2x8x32xf32>
      %cst_105 = arith.constant dense<0.000000e+00> : vector<2x8xf32>
      %214 = vector.multi_reduction <add>, %213, %cst_105 [2] : vector<2x8x32xf32> to vector<2x8xf32>
      %215 = vector.shape_cast %214 : vector<2x8xf32> to vector<2x8x1xf32>
      %cst_106 = arith.constant 3.200000e+01 : f32
      %216 = vector.broadcast %cst_106 : f32 to vector<2x8x1xf32>
      %217 = arith.divf %215, %216 : vector<2x8x1xf32>
      %218 = arith.mulf %212, %212 : vector<2x8x1xf32>
      %219 = arith.subf %217, %218 : vector<2x8x1xf32>
      %cst_107 = arith.constant 0.000000e+00 : f32
      %220 = vector.broadcast %cst_107 : f32 to vector<2x8x1xf32>
      %221 = arith.maximumf %219, %220 : vector<2x8x1xf32>
      %222 = vector.broadcast %212 : vector<2x8x1xf32> to vector<2x8x32xf32>
      %223 = arith.subf %206, %222 : vector<2x8x32xf32>
      %cst_108 = arith.constant 9.99999974E-6 : f32
      %224 = vector.broadcast %cst_108 : f32 to vector<2x8x1xf32>
      %225 = arith.addf %221, %224 : vector<2x8x1xf32>
      %226 = math.rsqrt %225 : vector<2x8x1xf32>
      %227 = vector.broadcast %226 : vector<2x8x1xf32> to vector<2x8x32xf32>
      %228 = arith.mulf %223, %227 : vector<2x8x32xf32>
      %229 = vector.shape_cast %207 : vector<1x32xf32> to vector<1x1x32xf32>
      %230 = vector.broadcast %229 : vector<1x1x32xf32> to vector<2x8x32xf32>
      %231 = arith.mulf %228, %230 : vector<2x8x32xf32>
      %232 = vector.shape_cast %208 : vector<1x32xf32> to vector<1x1x32xf32>
      %233 = vector.broadcast %232 : vector<1x1x32xf32> to vector<2x8x32xf32>
      %234 = arith.addf %231, %233 : vector<2x8x32xf32>
      %c0_109 = arith.constant 0 : index
      %c0_110 = arith.constant 0 : index
      %c0_111 = arith.constant 0 : index
      %235 = vector.load %arg18[%c0_109, %c0_110, %c0_111] : memref<2x8x32xf32, #tpu.memory_space<vmem>>, vector<2x8x32xf32>
      tpu.vector_store %arg18[%c0_109, %c0_110, %c0_111], %234 {strides = array<i32>} : memref<2x8x32xf32, #tpu.memory_space<vmem>>, vector<2x8x32xf32>,
    } else {
    }
    return
  }
  func.func @transform_0(%arg0: i32, %arg1: i32) -> (i32, i32, i32) {
    %c0_i32 = arith.constant 0 : i32
    %c0_i32_0 = arith.constant 0 : i32
    %c0_i32_1 = arith.constant 0 : i32
    return %arg0, %c0_i32, %c0_i32_0 : i32, i32, i32
  }
  func.func @transform_1(%arg0: i32, %arg1: i32) -> (i32, i32, i32) {
    %c0_i32 = arith.constant 0 : i32
    %c0_i32_0 = arith.constant 0 : i32
    %c0_i32_1 = arith.constant 0 : i32
    return %arg0, %c0_i32, %c0_i32_0 : i32, i32, i32
  }
  func.func @transform_2(%arg0: i32, %arg1: i32) -> (i32, i32, i32) {
    %c0_i32 = arith.constant 0 : i32
    %c0_i32_0 = arith.constant 0 : i32
    %c0_i32_1 = arith.constant 0 : i32
    return %arg1, %c0_i32, %c0_i32_0 : i32, i32, i32
  }
  func.func @transform_3(%arg0: i32, %arg1: i32) -> (i32, i32, i32) {
    %c0_i32 = arith.constant 0 : i32
    %c0_i32_0 = arith.constant 0 : i32
    %c0_i32_1 = arith.constant 0 : i32
    return %arg1, %c0_i32, %c0_i32_0 : i32, i32, i32
  }
  func.func @transform_4(%arg0: i32, %arg1: i32) -> (i32, i32, i32) {
    %c0_i32 = arith.constant 0 : i32
    %c0_i32_0 = arith.constant 0 : i32
    %c0_i32_1 = arith.constant 0 : i32
    return %arg1, %c0_i32, %c0_i32_0 : i32, i32, i32
  }
  func.func @transform_5(%arg0: i32, %arg1: i32) -> (i32, i32, i32) {
    %c0_i32 = arith.constant 0 : i32
    %c0_i32_0 = arith.constant 0 : i32
    %c0_i32_1 = arith.constant 0 : i32
    return %arg1, %c0_i32, %c0_i32_0 : i32, i32, i32
  }
  func.func @transform_6(%arg0: i32, %arg1: i32) -> (i32, i32, i32) {
    %c0_i32 = arith.constant 0 : i32
    %c0_i32_0 = arith.constant 0 : i32
    %c0_i32_1 = arith.constant 0 : i32
    return %arg1, %c0_i32, %c0_i32_0 : i32, i32, i32
  }
  func.func @transform_7(%arg0: i32, %arg1: i32) -> (i32, i32, i32) {
    %c0_i32 = arith.constant 0 : i32
    %c0_i32_0 = arith.constant 0 : i32
    %c0_i32_1 = arith.constant 0 : i32
    return %arg1, %c0_i32, %c0_i32_0 : i32, i32, i32
  }
  func.func @transform_8(%arg0: i32, %arg1: i32) -> (i32, i32, i32) {
    %c0_i32 = arith.constant 0 : i32
    %c0_i32_0 = arith.constant 0 : i32
    %c0_i32_1 = arith.constant 0 : i32
    return %arg1, %c0_i32, %c0_i32_0 : i32, i32, i32
  }
  func.func @transform_9(%arg0: i32, %arg1: i32) -> (i32, i32, i32) {
    %c0_i32 = arith.constant 0 : i32
    %c0_i32_0 = arith.constant 0 : i32
    %c0_i32_1 = arith.constant 0 : i32
    return %arg1, %c0_i32, %c0_i32_0 : i32, i32, i32
  }
  func.func @transform_10(%arg0: i32, %arg1: i32) -> (i32, i32, i32) {
    %c0_i32 = arith.constant 0 : i32
    %c0_i32_0 = arith.constant 0 : i32
    %c0_i32_1 = arith.constant 0 : i32
    return %arg1, %c0_i32, %c0_i32_0 : i32, i32, i32
  }
  func.func @transform_11(%arg0: i32, %arg1: i32) -> (i32, i32, i32) {
    %c0_i32 = arith.constant 0 : i32
    %c0_i32_0 = arith.constant 0 : i32
    %c0_i32_1 = arith.constant 0 : i32
    return %arg1, %c0_i32, %c0_i32_0 : i32, i32, i32
  }
  func.func @transform_12(%arg0: i32, %arg1: i32) -> (i32, i32, i32) {
    %c0_i32 = arith.constant 0 : i32
    %c0_i32_0 = arith.constant 0 : i32
    %c0_i32_1 = arith.constant 0 : i32
    return %arg1, %c0_i32, %c0_i32_0 : i32, i32, i32
  }
  func.func @transform_13(%arg0: i32, %arg1: i32) -> (i32, i32, i32) {
    %c0_i32 = arith.constant 0 : i32
    %c0_i32_0 = arith.constant 0 : i32
    %c0_i32_1 = arith.constant 0 : i32
    return %arg1, %c0_i32, %c0_i32_0 : i32, i32, i32
  }
  func.func @transform_14(%arg0: i32, %arg1: i32) -> (i32, i32) {
    %c0_i32 = arith.constant 0 : i32
    %c0_i32_0 = arith.constant 0 : i32
    %c0_i32_1 = arith.constant 0 : i32
    return %c0_i32, %c0_i32_0 : i32, i32
  }
  func.func @transform_15(%arg0: i32, %arg1: i32) -> (i32, i32) {
    %c0_i32 = arith.constant 0 : i32
    %c0_i32_0 = arith.constant 0 : i32
    %c0_i32_1 = arith.constant 0 : i32
    return %c0_i32, %c0_i32_0 : i32, i32
  }
  func.func @transform_16(%arg0: i32, %arg1: i32) -> (i32, i32, i32) {
    %c0_i32 = arith.constant 0 : i32
    %c0_i32_0 = arith.constant 0 : i32
    %c0_i32_1 = arith.constant 0 : i32
    return %arg0, %c0_i32, %c0_i32_0 : i32, i32, i32
  }
}

</mosaic_0001>

<bundles_post_ra>
// kernel: tpu_custom_call.1
= control target key start
LH: loop header
LB: loop body
LE: loop exit
PB: predicated region body
PF: predicated region fallthrough
CT: control target
= control target key end

     0   :  { %s3159_s0 = inlined_call_operand.hbm [shape: f32[2,8,32], index: 0, kind: input, shape index: {}]   ;;  %s3160_s1 = inlined_call_operand.hbm [shape: f32[2,1,8], index: 1, kind: input, shape index: {}]   ;;  %s3161_s2 = inlined_call_operand.hbm [shape: f32[2,1,32], index: 2, kind: input, shape index: {}]   ;;  %s3162_s3 = inlined_call_operand.hbm [shape: f32[2,1,32], index: 3, kind: input, shape index: {}]   ;;  %s3163_s4 = inlined_call_operand.vmem [shape: bf16[2,32,32], index: 4, kind: input, shape index: {}]   ;;  %s3164_s5 = inlined_call_operand.vmem [shape: bf16[2,32,32], index: 5, kind: input, shape index: {}]   ;;  %s3165_s6 = inlined_call_operand.vmem [shape: bf16[2,32,32], index: 6, kind: input, shape index: {}]   ;;  %s3166_s7 = inlined_call_operand.hbm [shape: bf16[2,32,32], index: 7, kind: input, shape index: {}]   ;;  %s3167_s8 = inlined_call_operand.vmem [shape: f32[2,1,32], index: 8, kind: input, shape index: {}]   ;;  %s3168_s9 = inlined_call_operand.vmem [shape: f32[2,1,32], index: 9, kind: input, shape index: {}]   ;;  %s3169_s10 = inlined_call_operand.hbm [shape: bf16[2,32,64], index: 10, kind: input, shape index: {}]   ;;  %s3170_s11 = inlined_call_operand.vmem [shape: f32[2,1,64], index: 11, kind: input, shape index: {}]   ;;  %s3171_s12 = inlined_call_operand.vmem [shape: bf16[2,64,32], index: 12, kind: input, shape index: {}]   ;;  %s3172_s13 = inlined_call_operand.vmem [shape: f32[2,1,32], index: 13, kind: input, shape index: {}]   ;;  %s3173_s14 = inlined_call_operand.vmem [shape: f32[1,32], index: 14, kind: input, shape index: {}]   ;;  %s3174_s15 = inlined_call_operand.vmem [shape: f32[1,32], index: 15, kind: input, shape index: {}]   ;;  %s3175_s16 = inlined_call_operand.hbm [shape: f32[2,8,32], index: 16, kind: output, shape index: {}]  }
   0x1   :  { %3180 = sst [smem:[#allocation22_spill]] %s3159_s0 }
   0x2   :  { %3181 = sst [smem:[#allocation23_spill]] %s3160_s1 }
   0x3   :  { %3182 = sst [smem:[#allocation24_spill]] %s3161_s2 }
   0x4   :  { %3183 = sst [smem:[#allocation25_spill]] %s3162_s3 }
   0x5   :  { %3184 = sst [smem:[#allocation26_spill]] %s3163_s4 }
   0x6   :  { %3185 = sst [smem:[#allocation27_spill]] %s3164_s5 }
   0x7   :  { %3186 = sst [smem:[#allocation28_spill]] %s3165_s6 }
   0x8   :  { %3187 = sst [smem:[#allocation29_spill]] %s3166_s7 }
   0x9   :  { %3188 = sst [smem:[#allocation30_spill]] %s3168_s9 }
   0xa   :  { %3189 = sst [smem:[#allocation31_spill]] %s3170_s11 }
   0xb   :  { %3190 = sst [smem:[#allocation32_spill]] %s3171_s12 }
   0xc   :  { %3191 = sst [smem:[#allocation33_spill]] %s3172_s13 }
   0xd   :  { %3192 = sst [smem:[#allocation34_spill]] %s3173_s14 }
   0xe   :  { %3193 = sst [smem:[#allocation35_spill]] %s3174_s15 }
   0xf   :  { %3194 = sst [smem:[#allocation36_spill]] %s3175_s16 }
  0x10   :  { %21 = vsyncpa [#allocation4], 0 }
  0x11   :  { %22 = vsyncpa [#allocation7], 0 }
  0x12   :  { %23 = vsyncpa [#allocation5], 0  ;;  %s2735_s21 = smov 0   ;;  %s2737_s22 = smov 0  }
  0x13   :  { %s2739_s23 = smov 0   ;;  %s2741_s24 = smov 0  }
  0x14   :  { %s2743_s25 = smov 0   ;;  %s2745_s26 = smov 0  }
  0x15 LB: > { %3195 = sst [smem:[#allocation17_spill]] %s2619_s23  ;;  %s2764_s27 = sadd.s32 4294967295, %s2631_s26   ;;  %s2631_s26 = sphi %s2745_s26, %s29_s26   ;;  %s2627_s25 = sphi %s2743_s25, %s3231_s25   ;;  %s2623_s24 = sphi %s2741_s24, %s3230_s24   ;;  %s2619_s23 = sphi %s2739_s23, %s3229_s23   ;;  %s2615_s22 = sphi %s2737_s22, %s3233_s22   ;;  %s2611_s21 = sphi %s2735_s21, %s3232_s21  }
  0x16   : > { %3196 = sst [smem:[#allocation18_spill]] %s2627_s25  ;;  %p113_p0 = scmp.ne.s32.totalorder %s2615_s22, %s2611_s21 }
  0x17   : > { %3197 = sst [smem:[#allocation19_spill]] %s2631_s26  ;;  %p114_p1 = scmp.eq.s32.totalorder %s2764_s27, 0 }
  0x18   : > { %p2066_p2 = scmp.ge.s32.totalorder %s2631_s26, 1  ;;  %p478_p3 = scmp.lt.s32.totalorder %s2631_s26, 3 }
  0x19   : > { %p2772_p4 = por %p114_p1, %p113_p0  ;;  %s3199_s0 = sld [smem:[#allocation22_spill]] }
  0x1a   : > { %p2779_p5 = pnand %p2066_p2, %p478_p3  ;;  %s2633_s19 = smov [#allocation3]  }
  0x1b   : > { %s494_s20 = sshll.u32 %s2633_s19, 4  ;;  %s2634_s29 = smov 128   ;;  %s495_s20 = int_to_ptr.vmem [resolvable:$true] %s494_s20 }
  0x1c   : > { %p2213_p6 = pneg %p2779_p5  ;;  %s2635_s30 = smov 8  }
  0x1d   : > { %s100_s16 = sadd.s32 1, %s2619_s23  ;;  %p107_p9 = scmp.ne.s32.totalorder %s2619_s23, %s2615_s22 }
  0x1e   : > { %p2787_p7 = pnand %p2213_p6, %p114_p1  ;;  %p108_p10 = scmp.eq.s32.totalorder %s2631_s26, 0 }
  0x1f   : > { %s492_s17 = sshll.u32 %s3199_s0, 4  ;;  %s38_s0 = sadd.s32 1, %s2627_s25  ;;  %s493_s17 = int_to_ptr.hbm [resolvable:$true] %s492_s17 }
  0x20   : > { %2216 = dma.hbm_to_vmem [thread:$0]  (!%p2787_p7), %s493_s17, 256, %s495_s20, [#allocation4], %s2634_s29, %s2634_s29, %s2635_s30  }
  0x21   : > { %p39_p8 = scmp.ge.s32.totalorder %s38_s0, 2  ;;  %p2800_p11 = por %p108_p10, %p107_p9 }
  0x22   : > { %p2235_p12 = scmp.lt.s32.totalorder %s2631_s26, 2  ;;  %s530_s14 = sand.u32 1, %s2631_s26  }
  0x23   : > { %s3235_s0 = smov (%p39_p8, %s38_s0), 0  ;;  %s2809_s13 = sand.u32 1, %s2619_s23  }
  0x24   : > { %3202 = sst [smem:[#allocation20_spill]] %s3235_s0  ;;  %s97_s15 = ssub.s32 %s2627_s25, %s3235_s0 }
  0x25   : > { %p98_p13 = scmp.eq.s32.totalorder %s97_s15, 0  ;;  %s3204_s2 = sld [smem:[#allocation24_spill]] }
  0x26   : > { %s533_s11 = scalar_lea.vmem [#allocation8], %s2809_s13  ;;  %p2821_p0 = pnand %p2235_p12, %p2800_p11 }
  0x27   : > { %s2816_s30 = scalar_select %p98_p13, %s2619_s23, %s100_s16  }
  0x28   : > { %s540_s9 = sshll.u32 %s533_s11, 4  ;;  %s2826_s20 = scalar_lea.sflag [#allocation4], %s530_s14  ;;  %s541_s9 = int_to_ptr.vmem [resolvable:$true] %s540_s9 }
  0x29   : > { %3205 = sst [smem:[#allocation21_spill]] %s2816_s30  ;;  %s550_s19 = scalar_lea.vmem [#allocation9], %s2809_s13 }
  0x2a   : > { %s3207_s3 = sld [smem:[#allocation25_spill]]  ;;  %s557_s0 = sshll.u32 %s550_s19, 4  ;;  %s558_s0 = int_to_ptr.vmem [resolvable:$true] %s557_s0 }
  0x2b   : > { %s536_s29 = scalar_lea.hbm %s3204_s2, %s2627_s25  ;;  %s2173_s17 = sshll.u32 %s2627_s25, 4 }
  0x2c   : > { %s538_s12 = sshll.u32 %s536_s29, 4  ;;  %s3208_s14 = sshll.u32 %s2809_s13, 4  ;;  %s539_s12 = int_to_ptr.hbm [resolvable:$true] %s538_s12 }
  0x2d   : > { %2223 = dma.hbm_to_vmem [thread:$0]  (!%p2821_p0), %s539_s12, 16, %s541_s9, %s2826_s20  }
  0x2e   : > { %s592_s30 = scalar_lea.vmem [#allocation10], %s3208_s14  ;;  %s3209_s7 = sld [smem:[#allocation29_spill]] }
  0x2f   : > { %s600_s23 = sshll.u32 %s592_s30, 4  ;;  %s2637_s16 = smov 4   ;;  %s601_s23 = int_to_ptr.vmem [resolvable:$true] %s600_s23 }
  0x30   : > { %s553_s2 = scalar_lea.hbm %s3207_s3, %s2627_s25  ;;  %s3210_s1 = sld [smem:[#allocation23_spill]] }
  0x31   : > { %s555_s11 = sshll.u32 %s553_s2, 4  ;;  %s2636_s2 = smov 64   ;;  %s556_s11 = int_to_ptr.hbm [resolvable:$true] %s555_s11 }
  0x32   : > { %2226 = dma.hbm_to_vmem [thread:$0]  (!%p2821_p0), %s556_s11, 16, %s558_s0, %s2826_s20  }
  0x33   : > { %s2638_s30 = smov [#allocation6]   ;;  %s631_s14 = scalar_lea.hbm %s3169_s10, %s2173_s17 }
  0x34   : > { %s597_s9 = scalar_lea.hbm %s3209_s7, %s2173_s17  ;;  %s510_s19 = sshll.u32 %s2638_s30, 4  ;;  %s511_s19 = int_to_ptr.vmem [resolvable:$true] %s510_s19 }
  0x35   : > { %s598_s12 = sshll.u32 %s597_s9, 4  ;;  %s2639_s9 = smov 16   ;;  %s599_s12 = int_to_ptr.hbm [resolvable:$true] %s598_s12 }
  0x36   : > { %2229 = dma.hbm_to_vmem [thread:$0]  (!%p2821_p0), %s599_s12, 256, %s601_s23, %s2826_s20, %s2636_s2, %s2636_s2, %s2637_s16  }
  0x37   : > { %s508_s11 = sshll.u32 %s3210_s1, 4  ;;  %s2640_s3 = smov 1   ;;  %s509_s11 = int_to_ptr.hbm [resolvable:$true] %s508_s11 }
  0x38   : > { %2219 = dma.hbm_to_vmem [thread:$0]  (!%p2787_p7), %s509_s11, 32, %s511_s19, [#allocation7], %s2639_s9, %s2639_s9, %s2640_s3  }
  0x39   : > { %s632_s7 = sshll.u32 %s631_s14, 4  ;;  %s3211_s25 = sshll.u32 %s2809_s13, 4  ;;  %s633_s7 = int_to_ptr.hbm [resolvable:$true] %s632_s7 }
  0x3a   : > { %s626_s5 = scalar_lea.vmem [#allocation11], %s3211_s25  ;;  %666 = sbr.rel (%p2779_p5) target bundleno = 1964 (0x7ac), region = 84 }
  0x3b   : > { %s634_s23 = sshll.u32 %s626_s5, 4  ;;  %s635_s23 = int_to_ptr.vmem [resolvable:$true] %s634_s23 }
  0x3c   : > { %2232 = dma.hbm_to_vmem [thread:$0]  (!%p2821_p0), %s633_s7, 256, %s635_s23, %s2826_s20, %s2636_s2, %s2636_s2, %s2637_s16  }
  0x3f   : > { %2594 = dma.done.wait (%p114_p1), [#allocation4], 256  }
  0x40   : > { %2596 = vsyncadd (%p114_p1), [#allocation4], 4294967040 }
  0x41   : > { %2598 = dma.done.wait (%p114_p1), [#allocation7], 32  }
  0x42   : > { %2600 = vsyncadd (%p114_p1), [#allocation7], 4294967264  ;;  %s678_s3 = sand.u32 1, %s2764_s27   ;;  %s2873_s5 = sand.u32 1, %s2615_s22  }
  0x43   : > { %s679_s7 = scalar_lea.sflag [#allocation4], %s678_s3 }
  0x44   : > { %2602 = dma.done.wait (%p2772_p4), %s679_s7, 544  }
  0x45   : > { %2604 = vsyncadd (%p2772_p4), %s679_s7, 4294966752  ;;  %s2079_s25 = sshll.u32 %s2873_s5, 4  ;;  %p802_p1 = scmp.lt.s32.totalorder %s2623_s24, 1 }
  0x46   : > { %s3212_s4 = sld [smem:[#allocation26_spill]]  ;;  %s2924_s19 = scalar_lea.vmem [#allocation10], %s2079_s25 }
  0x47   : > { %s2883_s18 = scalar_select %p802_p1, %s2623_s24, 1 }
  0x48   : > { %s3213_s29 = sld [smem:[#allocation27_spill]]  ;;  %p2089_p2 = scmp.ne.s32.totalorder %s2623_s24, 0 }
  0x49   : > { %s2175_s21 = sshll.u32 %s2883_s18, 4  ;;  %s3214_s6 = sld [smem:[#allocation28_spill]] }
  0x4a   : > { %s3215_s23 = sld [smem:[#allocation30_spill]]  ;;  %s2178_s12 = sshll.u32 %s2883_s18, 5 }
  0x4b   : > { %s3216_s17 = sld [smem:[#allocation31_spill]] }
  0x4c   : > { %s2893_s2 = scalar_lea.vmem %s3212_s4, %s2175_s21  ;;  %s3217_s1 = sld [smem:[#allocation32_spill]] }
  0x4d   : > { %s3218_s4 = sld [smem:[#allocation33_spill]] }
  0x4e   : > { %s2898_s11 = scalar_lea.vmem %s3213_s29, %s2175_s21 }
  0x4f   : > { %s2903_s26 = scalar_lea.vmem %s3214_s6, %s2175_s21  ;;  %s690_s21 = scalar_lea.vmem [#allocation9], %s2873_s5 }
  0x50   : > { %s822_s3 = scalar_lea.vmem %s3215_s23, %s2883_s18  ;;  %s2926_s6 = scalar_lea.vmem [#allocation11], %s2079_s25 }
  0x51   : > { %s825_s20 = scalar_lea.vmem %s3216_s17, %s2883_s18  ;;  %839 = sbr.rel (%p2089_p2) target bundleno = 89 (0x59), region = 112 }
  0x52   : > { %s2917_s16 = scalar_lea.vmem %s3217_s1, %s2178_s12 }
  0x53   : > { %s833_s30 = scalar_lea.vmem %s3218_s4, %s2883_s18 }
  0x56   : > { %v840_v0 = vld [vmem:[#allocation3] sm:$0xff]  ;;  %vm842_vm0 = vcmask 261120   ;;  %v841_v1 = vld [vmem:[#allocation3 + $0x8] sm:$0xff] }
  0x57   : > { %843 = vst.msk [vmem:[#allocation12] sm:$0xff] %vm842_vm0, %v840_v0 }
  0x58   : > { %844 = vst.msk [vmem:[#allocation12 + $0x8] sm:$0xff] %vm842_vm0, %v841_v1 }
  0x59 PF: > { %vm851_vm1 = vcmask 261120   ;;  %v2641_v10 = vmov 32.0   ;;  %v2180_v23 = vld [vmem:[%s2893_s2 + $0x8] sm:$0xff]  ;;  %v2179_v27 = vld [vmem:[%s2893_s2] sm:$0xff]  ;;  %s3219_s1 = scalar_lea.vmem [#allocation8], %s2873_s5  ;;  %vm1044_vm9 = vcmask 64512   ;;  %s3220_s14 = scalar_lea.vmem %s3167_s8, %s2883_s18 }
  0x5a   : > { %2313 = vrcp.f32 %v2641_v10  ;;  %v2182_v24 = vld [vmem:[%s2898_s11 + $0x8] sm:$0xff]  ;;  %951 = vmatpush.bf16.msra.mxu0 %v2180_v23  ;;  %v2181_v28 = vld [vmem:[%s2898_s11] sm:$0xff]  ;;  %vm963_vm10 = vcmask 257024   ;;  %s2642_s4 = smov 120   ;;  %vm1110_vm11 = vcmask 1043456   ;;  %s2643_s5 = smov 112  }
  0x5b   : > { %v2184_v25 = vld [vmem:[%s2903_s26 + $0x8] sm:$0xff]  ;;  %988 = vmatpush.bf16.msra.mxu1 %v2182_v24  ;;  %v2183_v30 = vld [vmem:[%s2903_s26] sm:$0xff]  ;;  %s2644_s13 = smov 104   ;;  %s2645_s25 = smov 8   ;;  %vm1544_vm12 = vcmask 130048   ;;  %vm1549_vm13 = vcmask 195584  }
  0x5c   : > { %1020 = vmatpush.bf16.msra.mxu2 %v2184_v25  ;;  %v2305_v51 = vld [vmem:[%s3219_s1] ss:$0 sm:$0xff]  ;;  %s2646_s28 = smov 16   ;;  %s2647_s2 = smov 24  }
  0x5d   : > { %v2306_v55 = vld [vmem:[%s690_s21] ss:$0 sm:$0xff]  ;;  %p2168_p3 = scmp.ne.s32.totalorder %s2623_s24, 1 }
  0x5e   : > { %v2929_v2 = vld [vmem:[#allocation12] sm:$0xff]  ;;  %952 = vmatpush.bf16.msra.mxu0 %v2179_v27  ;;  %s3225_s21 = sld [smem:[#allocation35_spill]] (!%p2168_p3) }
  0x5f   : > { %v852_v3 = vsel %vm851_vm1, %v2929_v2, 0.0  ;;  %v867_v4 = vmul.f32 %v2929_v2, %v2929_v2  ;;  %v2935_v5 = vld [vmem:[#allocation12 + $0x8] sm:$0xff]  ;;  %989 = vmatpush.bf16.msra.mxu1 %v2181_v28 }
  0x60   : > { %853 = vadd.xlane.f32.xlu0 %v852_v3  ;;  %v868_v7 = vmul.f32 %v2935_v5, %v2935_v5  ;;  %v855_v8 = vsel %vm851_vm1, %v2935_v5, 0.0  ;;  %v2314_v11 = vpop.eup %2313  ;;  %1021 = vmatpush.bf16.msra.mxu2 %v2183_v30 }
  0x61   : > { %v869_v6 = vsel %vm851_vm1, %v867_v4, 0.0  ;;  %v859_v12 = vmul.f32 32.0, %v2314_v11  ;;  %vm863_vm2 = vweird.f32 %v2314_v11 }
  0x62   : > { %870 = vadd.xlane.f32.xlu1 %v869_v6  ;;  %v872_v9 = vsel %vm851_vm1, %v868_v7, 0.0 }
  0x63   : > { %v860_v13 = vsub.f32 1.0, %v859_v12 }
  0x65   : > { %v861_v14 = vmul.f32 %v2314_v11, %v860_v13 }
  0x67   : > { %v862_v15 = vadd.f32 %v2314_v11, %v861_v14 }
  0x68   : > { %856 = vadd.xlane.f32.xlu0 %v855_v8 }
  0x69   : > { %v2943_v16 = vsel %vm863_vm2, %v2314_v11, %v862_v15 }
  0x6a   : > { %873 = vadd.xlane.f32.xlu1 %v872_v9 }
  0xd3   : > { %v854_v17 = vpop.xlane.xlu0 %853 }
  0xd4   : > { %v865_v18 = vmul.f32 %v2943_v16, %v854_v17 }
  0xd5   : > { %v871_v19 = vpop.xlane.xlu1 %870 }
  0xd6   : > { %v877_v20 = vmul.f32 %v865_v18, %v865_v18  ;;  %v875_v21 = vmul.f32 %v871_v19, %v2943_v16  ;;  %v883_v47 = vsub.f32 %v2929_v2, %v865_v18 }
  0xd8   : > { %v879_v22 = vsub.f32 %v875_v21, %v877_v20 }
  0xda   : > { %v881_v26 = vmax.f32 %v879_v22, 0.0 }
  0xdb   : > { %v857_v29 = vpop.xlane.xlu0 %856 }
  0xdc   : > { %v885_v31 = vadd.f32 1e-05, %v881_v26  ;;  %v866_v32 = vmul.f32 %v2943_v16, %v857_v29 }
  0xdd   : > { %v874_v33 = vpop.xlane.xlu1 %873 }
  0xde   : > { %2315 = vrsqrt.f32 %v885_v31  ;;  %v878_v34 = vmul.f32 %v866_v32, %v866_v32  ;;  %v876_v35 = vmul.f32 %v874_v33, %v2943_v16  ;;  %vm893_vm4 = vweird.f32 %v885_v31 }
  0xdf   : > { %v884_v57 = vsub.f32 %v2935_v5, %v866_v32 }
  0xe0   : > { %v880_v36 = vsub.f32 %v876_v35, %v878_v34 }
  0xe2   : > { %v882_v37 = vmax.f32 %v880_v36, 0.0 }
  0xe4   : > { %v2316_v38 = vpop.eup %2315  ;;  %v886_v40 = vadd.f32 1e-05, %v882_v37 }
  0xe5   : > { %v888_v39 = vmul.f32 %v2316_v38, %v885_v31  ;;  %vm894_vm3 = vweird.f32 %v2316_v38 }
  0xe6   : > { %2317 = vrsqrt.f32 %v886_v40  ;;  %vm895_vm5 = vmor %vm893_vm4, %vm894_vm3  ;;  %vm903_vm7 = vweird.f32 %v886_v40 }
  0xe7   : > { %v889_v41 = vmul.f32 %v2316_v38, %v888_v39 }
  0xe9   : > { %v890_v42 = vmul.f32 0.5, %v889_v41 }
  0xeb   : > { %v891_v43 = vsub.f32 1.5, %v890_v42 }
  0xec   : > { %v2318_v44 = vpop.eup %2317 }
  0xed   : > { %v892_v45 = vmul.f32 %v2316_v38, %v891_v43  ;;  %v898_v46 = vmul.f32 %v2318_v44, %v886_v40  ;;  %vm904_vm6 = vweird.f32 %v2318_v44 }
  0xee   : > { %vm905_vm8 = vmor %vm903_vm7, %vm904_vm6 }
  0xef   : > { %v896_v48 = vsel %vm895_vm5, %v2316_v38, %v892_v45  ;;  %v899_v49 = vmul.f32 %v2318_v44, %v898_v46  ;;  %vm1739_vm5 = vcmask 523264  }
  0xf0   : > { %v907_v50 = vmul.f32 %v896_v48, %v883_v47  ;;  %v2307_v48 = vld [vmem:[#allocation6] ss:$0 sm:$0xff] }
  0xf1   : > { %v900_v52 = vmul.f32 0.5, %v899_v49  ;;  %v2308_v49 = vld [vmem:[#allocation6 + $0x1] ss:$0 sm:$0xff] }
  0xf2   : > { %v912_v54 = vmul.f32 %v2305_v51, %v907_v50 }
  0xf3   : > { %v901_v53 = vsub.f32 1.5, %v900_v52 }
  0xf4   : > { %v917_v60 = vadd.f32 %v2306_v55, %v912_v54 }
  0xf5   : > { %v902_v56 = vmul.f32 %v2318_v44, %v901_v53 }
  0xf6   : > { %v919_v63 = vpack.c.bf16 %v917_v60, %v917_v60 }
  0xf7   : > { %v906_v58 = vsel %vm905_vm8, %v2318_v44, %v902_v56 }
  0xf8   : > { %v908_v59 = vmul.f32 %v906_v58, %v884_v57  ;;  %v927_v1 = vunpack.c.l.b16 %v919_v63 }
  0xfa   : > { %v913_v61 = vmul.f32 %v2305_v51, %v908_v59 }
  0xfc   : > { %v918_v62 = vadd.f32 %v2306_v55, %v913_v61 }
  0xfe   : > { %v920_v0 = vpack.c.bf16 %v918_v62, %v918_v62 }
 0x100   : > { %v928_v3 = vunpack.c.l.b16 %v920_v0 }
 0x102   : > { %v929_v4 = vpack.c.b16 %v928_v3, %v927_v1 }
 0x104   : > { %2098 = vmatmul.msk.bf16.vlgmr.msra.gmra.mxu0 %vm851_vm1, %v929_v4  ;;  %2107 = vmatmul.msk.bf16.vlgmr.msra.gmra.mxu1 %vm851_vm1, %v929_v4 }
 0x105   : > { %2116 = vmatmul.msk.bf16.vlgmr.msra.gmra.mxu2 %vm851_vm1, %v929_v4 }
 0x181   : > { %v954_v6 = vpop.f32.mrf.mxu0  ;;  %v991_v7 = vpop.f32.mrf.mxu1 }
 0x182   : > { %v959_v8 = vmul.f32 0.35355338, %v954_v6  ;;  %v996_v9 = vpack.c.bf16 %v991_v7, %v991_v7 }
 0x184   : > { %v961_v10 = vpack.c.bf16 %v959_v8, %v959_v8  ;;  %v1154_v11 = vunpack.c.l.b16 %v996_v9  ;;  %v1049_v12 = vsel %vm1044_vm9, %v996_v9, 0 }
 0x185   : > { %1058 = vmatpush.bf16.xpose.msra.mxu3 %v1049_v12 }
 0x186   : > { %964 = vst.msk [vmem:[#allocation2] sm:$0xf] %vm963_vm10, %v961_v10  ;;  %v1155_v13 = vpack.c.b16 %v1154_v11, %v1154_v11 }
 0x188   : > { %v1023_v14 = vpop.f32.mrf.mxu2  ;;  %1156 = vrot.lane.b32.xlu2 %v1155_v13, %s2642_s4 }
 0x189   : > { %v2967_v15 = vpack.c.bf16 %v1023_v14, %v1023_v14  ;;  %v956_v17 = vpop.f32.mrf.mxu0  ;;  %v993_v18 = vpop.f32.mrf.mxu1 }
 0x18a   : > { %v960_v19 = vmul.f32 0.35355338, %v956_v17  ;;  %v997_v20 = vpack.c.bf16 %v993_v18, %v993_v18 }
 0x18b   : > { %v1112_v21 = vsel %vm1110_vm11, %v2967_v15, 0 }
 0x18c   : > { %v962_v22 = vpack.c.bf16 %v960_v19, %v960_v19  ;;  %v1183_v23 = vunpack.c.l.b16 %v997_v20  ;;  %1121 = vmatpush.bf16.msrb.mxu1 %v1112_v21  ;;  %v1068_v24 = vsel %vm1044_vm9, %v997_v20, 0 }
 0x18d   : > { %1077 = vmatpush.bf16.xpose.msrb.mxu0 %v1068_v24  ;;  %v1036_v25 = vld [vmem:[#allocation2] sm:$0xf] }
 0x18e   : > { %965 = vst.msk [vmem:[#allocation2 + $0x4] sm:$0xf] %vm963_vm10, %v962_v22  ;;  %v1184_v26 = vpack.c.b16 %v1183_v23, %v1183_v23  ;;  %2117 = vmatmul.msk.bf16.vlgmr.msra.gmra.mxu3 %vm1044_vm9, %v1036_v25  ;;  %v1149_v27 = vunpack.c.l.b16 %v1036_v25 }
 0x190   : > { %v1150_v28 = vpack.c.b16 %v1149_v27, %v1149_v27  ;;  %v1025_v29 = vpop.f32.mrf.mxu2  ;;  %1185 = vrot.lane.b32.xlu2 %v1184_v26, %s2642_s4 }
 0x191   : > { %v2975_v30 = vpack.c.bf16 %v1025_v29, %v1025_v29 }
 0x192   : > { %1151 = vrot.lane.b32.xlu0 %v1150_v28, %s2642_s4 }
 0x193   : > { %v1131_v31 = vsel %vm1110_vm11, %v2975_v30, 0 }
 0x194   : > { %1140 = vmatpush.bf16.msrb.mxu2 %v1131_v31 }
 0x195   : > { %v1037_v32 = vld [vmem:[#allocation2 + $0x4] sm:$0xf] }
 0x196   : > { %2118 = vmatmul.msk.bf16.vlgmr.msrb.gmra.mxu0 %vm1044_vm9, %v1037_v32  ;;  %v1178_v33 = vunpack.c.l.b16 %v1037_v32 }
 0x198   : > { %1282 = vrot.lane.b32.xlu2 %v1155_v13, %s2643_s5  ;;  %v1179_v34 = vpack.c.b16 %v1178_v33, %v1178_v33 }
 0x19a   : > { %1303 = vrot.lane.b32.xlu0 %v1179_v34, %s2643_s5  ;;  %1180 = vrot.lane.b32.xlu1 %v1179_v34, %s2642_s4 }
 0x1a0   : > { %1305 = vrot.lane.b32.xlu2 %v1184_v26, %s2643_s5 }
 0x1a2   : > { %1394 = vrot.lane.b32.xlu0 %v1150_v28, %s2644_s13  ;;  %1419 = vrot.lane.b32.xlu1 %v1184_v26, %s2644_s13 }
 0x1a8   : > { %1280 = vrot.lane.b32.xlu2 %v1150_v28, %s2643_s5 }
 0x1b0   : > { %1396 = vrot.lane.b32.xlu2 %v1155_v13, %s2644_s13 }
 0x1b8   : > { %1417 = vrot.lane.b32.xlu2 %v1179_v34, %s2644_s13 }
 0x1e2   : > { %v1157_v35 = vpop.permute.xlu2 %1156 }
 0x1e3   : > { %v1162_v36 = vsel %vm1044_vm9, %v1157_v35, 0  ;;  %v1231_v35 = vunpack.c.l.b16 %v2967_v15 }
 0x1e4   : > { %1171 = vmatpush.bf16.xpose.msrb.mxu3 %v1162_v36 }
 0x1ea   : > { %v1186_v37 = vpop.permute.xlu2 %1185 }
 0x1eb   : > { %v1191_v38 = vsel %vm1044_vm9, %v1186_v37, 0 }
 0x1ec   : > { %1200 = vmatpush.bf16.xpose.msra.mxu0 %v1191_v38  ;;  %v3016_v38 = vpack.c.b16 %v1231_v35, %v1231_v35 }
 0x1f2   : > { %v1283_v39 = vpop.permute.xlu2 %1282 }
 0x1f3   : > { %v1288_v40 = vsel %vm1044_vm9, %v1283_v39, 0 }
 0x1f4   : > { %1297 = vmatpush.bf16.xpose.msra.mxu3 %v1288_v40  ;;  %v1255_v40 = vunpack.c.l.b16 %v2975_v30 }
 0x1fa   : > { %v1306_v41 = vpop.permute.xlu2 %1305 }
 0x1fb   : > { %v1311_v42 = vsel %vm1044_vm9, %v1306_v41, 0  ;;  %v1256_v41 = vpack.c.b16 %v1255_v40, %v1255_v40 }
 0x1fc   : > { %1320 = vmatpush.bf16.xpose.msrb.mxu0 %v1311_v42 }
 0x202   : > { %v1281_v43 = vpop.permute.xlu2 %1280 }
 0x204   : > { %v1152_v44 = vpop.permute.xlu0 %1151 }
 0x205   : > { %2121 = vmatmul.msk.bf16.vlgmr.msrb.gmra.mxu3 %vm1044_vm9, %v1152_v44 }
 0x20a   : > { %v1397_v45 = vpop.permute.xlu2 %1396 }
 0x20b   : > { %v1402_v46 = vsel %vm1044_vm9, %v1397_v45, 0 }
 0x20c   : > { %1411 = vmatpush.bf16.xpose.msrb.mxu3 %v1402_v46  ;;  %v1181_v47 = vpop.permute.xlu1 %1180  ;;  %v1304_v59 = vpop.permute.xlu0 %1303 }
 0x20d   : > { %2122 = vmatmul.msk.bf16.vlgmr.msra.gmra.mxu0 %vm1044_vm9, %v1181_v47 }
 0x211   : > { %v1060_v50 = vpop.f32.mrf.mxu3 }
 0x212   : > { %v1061_v51 = vadd.f32 %v2307_v48, %v1060_v50  ;;  %v1418_v62 = vpop.permute.xlu2 %1417 }
 0x213   : > { %v1079_v52 = vpop.f32.mrf.mxu0 }
 0x214   : > { %v1080_v53 = vadd.f32 %v2308_v49, %v1079_v52  ;;  %v1420_v54 = vpop.permute.xlu1 %1419  ;;  %v1083_v55 = vsel %vm1044_vm9, %v1061_v51, -inf  ;;  %v1395_v61 = vpop.permute.xlu0 %1394 }
 0x215   : > { %v1425_v56 = vsel %vm1044_vm9, %v1420_v54, 0  ;;  %2125 = vmatmul.msk.bf16.vlgmr.msra.gmra.mxu3 %vm1044_vm9, %v1281_v43  ;;  %1084 = vmax.xlane.f32.xlu0 %v1083_v55 }
 0x216   : > { %1434 = vmatpush.bf16.xpose.msra.mxu0 %v1425_v56  ;;  %v1086_v57 = vsel %vm1044_vm9, %v1080_v53, -inf }
 0x217   : > { %1087 = vmax.xlane.f32.xlu1 %v1086_v57 }
 0x219   : > { %v1062_v58 = vpop.f32.mrf.mxu3 }
 0x21b   : > { %v1081_v60 = vpop.f32.mrf.mxu0 }
 0x21d   : > { %2126 = vmatmul.msk.bf16.vlgmr.msrb.gmra.mxu0 %vm1044_vm9, %v1304_v59 }
 0x225   : > { %2129 = vmatmul.msk.bf16.vlgmr.msrb.gmra.mxu3 %vm1044_vm9, %v1395_v61 }
 0x22d   : > { %2130 = vmatmul.msk.bf16.vlgmr.msra.gmra.mxu0 %vm1044_vm9, %v1418_v62 }
 0x288   : > { %v1173_v63 = vpop.f32.mrf.mxu3  ;;  %v1085_v0 = vpop.xlane.xlu0 %1084 }
 0x289   : > { %v1174_v1 = vadd.f32 %v2307_v48, %v1173_v63  ;;  %v1089_v3 = vsub.f32 %v1061_v51, %v1085_v0 }
 0x28a   : > { %v1202_v4 = vpop.f32.mrf.mxu0  ;;  %v1088_v6 = vpop.xlane.xlu1 %1087 }
 0x28b   : > { %v1091_v7 = vmul.f32 1.442695, %v1089_v3  ;;  %v1203_v8 = vadd.f32 %v2308_v49, %v1202_v4  ;;  %v1090_v9 = vsub.f32 %v1080_v53, %v1088_v6  ;;  %v1206_v10 = vsel %vm1044_vm9, %v1174_v1, -inf }
 0x28c   : > { %1207 = vmax.xlane.f32.xlu1 %v1206_v10 }
 0x28d   : > { %2319 = vpow2.f32 %v1091_v7  ;;  %v1093_v11 = vmul.f32 1.442695, %v1090_v9  ;;  %v1209_v12 = vsel %vm1044_vm9, %v1203_v8, -inf }
 0x28e   : > { %1210 = vmax.xlane.f32.xlu2 %v1209_v12 }
 0x28f   : > { %2321 = vpow2.f32 %v1093_v11 }
 0x290   : > { %v1175_v13 = vpop.f32.mrf.mxu3 }
 0x292   : > { %v1204_v14 = vpop.f32.mrf.mxu0 }
 0x293   : > { %v2320_v17 = vpop.eup %2319 }
 0x294   : > { %v1095_v18 = vsel %vm1044_vm9, %v2320_v17, 0.0 }
 0x295   : > { %v2322_v19 = vpop.eup %2321  ;;  %1096 = vadd.xlane.f32.xlu1 %v1095_v18 }
 0x296   : > { %v1098_v20 = vsel %vm1044_vm9, %v2322_v19, 0.0 }
 0x297   : > { %1099 = vadd.xlane.f32.xlu0 %v1098_v20 }
 0x298   : > { %v1299_v21 = vpop.f32.mrf.mxu3 }
 0x299   : > { %v1300_v22 = vadd.f32 %v2307_v48, %v1299_v21 }
 0x29a   : > { %v1322_v23 = vpop.f32.mrf.mxu0 }
 0x29b   : > { %v1323_v24 = vadd.f32 %v2308_v49, %v1322_v23  ;;  %v1326_v25 = vsel %vm1044_vm9, %v1300_v22, -inf }
 0x29c   : > { %1327 = vmax.xlane.f32.xlu2 %v1326_v25 }
 0x29d   : > { %v1329_v26 = vsel %vm1044_vm9, %v1323_v24, -inf }
 0x29f   : > { %1330 = vmax.xlane.f32.xlu0 %v1329_v26 }
 0x2a0   : > { %v1301_v27 = vpop.f32.mrf.mxu3 }
 0x2a2   : > { %v1324_v28 = vpop.f32.mrf.mxu0 }
 0x2a8   : > { %v1413_v29 = vpop.f32.mrf.mxu3 }
 0x2a9   : > { %v3010_v31 = vadd.f32 %v2307_v48, %v1413_v29 }
 0x2aa   : > { %v1436_v32 = vpop.f32.mrf.mxu0 }
 0x2ab   : > { %v1437_v33 = vadd.f32 %v2308_v49, %v1436_v32  ;;  %v1440_v34 = vsel %vm1044_vm9, %v3010_v31, -inf }
 0x2ac   : > { %1441 = vmax.xlane.f32.xlu2 %v1440_v34 }
 0x2ad   : > { %v1443_v36 = vsel %vm1044_vm9, %v1437_v33, -inf }
 0x2ae   : > { %1444 = vmax.xlane.f32.xlu1 %v1443_v36 }
 0x2b0   : > { %v1415_v37 = vpop.f32.mrf.mxu3 }
 0x2b2   : > { %v1438_v39 = vpop.f32.mrf.mxu0 }
 0x2b3   : > { %1233 = vrot.lane.b32.xlu0 %v3016_v38, %s2642_s4 }
 0x2c4   : > { %1371 = vrot.lane.b32.xlu2 %v1256_v41, %s2643_s5 }
 0x2c7   : > { %1257 = vrot.lane.b32.xlu1 %v1256_v41, %s2642_s4 }
 0x2ff   : > { %v1208_v42 = vpop.xlane.xlu1 %1207 }
 0x300   : > { %v1212_v43 = vsub.f32 %v1174_v1, %v1208_v42 }
 0x301   : > { %v1211_v15 = vpop.xlane.xlu2 %1210 }
 0x302   : > { %v1214_v44 = vmul.f32 1.442695, %v1212_v43  ;;  %v1213_v45 = vsub.f32 %v1203_v8, %v1211_v15 }
 0x304   : > { %2323 = vpow2.f32 %v1214_v44  ;;  %v1216_v46 = vmul.f32 1.442695, %v1213_v45 }
 0x306   : > { %2325 = vpow2.f32 %v1216_v46 }
 0x308   : > { %v1097_v47 = vpop.xlane.xlu1 %1096 }
 0x309   : > { %2327 = vrcp.f32 %v1097_v47 }
 0x30a   : > { %v2324_v48 = vpop.eup %2323  ;;  %v1100_v49 = vpop.xlane.xlu0 %1099 }
 0x30b   : > { %2329 = vrcp.f32 %v1100_v49  ;;  %v1218_v30 = vsel %vm1044_vm9, %v2324_v48, 0.0 }
 0x30c   : > { %v2326_v50 = vpop.eup %2325  ;;  %1219 = vadd.xlane.f32.xlu2 %v1218_v30 }
 0x30d   : > { %v1221_v51 = vsel %vm1044_vm9, %v2326_v50, 0.0 }
 0x30e   : > { %1222 = vadd.xlane.f32.xlu0 %v1221_v51 }
 0x30f   : > { %v2328_v52 = vpop.eup %2327  ;;  %v1328_v53 = vpop.xlane.xlu2 %1327 }
 0x310   : > { %v1103_v54 = vmul.f32 %v2328_v52, %v2320_v17  ;;  %v1332_v55 = vsub.f32 %v1300_v22, %v1328_v53 }
 0x311   : > { %v2330_v56 = vpop.eup %2329 }
 0x312   : > { %v1104_v57 = vmul.f32 %v2330_v56, %v2322_v19  ;;  %v1334_v58 = vmul.f32 1.442695, %v1332_v55  ;;  %v1331_v59 = vpop.xlane.xlu0 %1330  ;;  %v1105_v60 = vpack.c.bf16 %v1103_v54, %v1103_v54 }
 0x313   : > { %v1333_v61 = vsub.f32 %v1323_v24, %v1331_v59 }
 0x314   : > { %2331 = vpow2.f32 %v1334_v58  ;;  %2119 = vmatmul.msk.bf16.vlgmr.msrb.gmra.mxu1 %vm1044_vm9, %v1105_v60  ;;  %v1106_v62 = vpack.c.bf16 %v1104_v57, %v1104_v57 }
 0x315   : > { %v1336_v63 = vmul.f32 1.442695, %v1333_v61 }
 0x316   : > { %2120 = vmatmul.msk.bf16.vlgmr.msrb.gmra.mxu2 %vm1044_vm9, %v1106_v62 }
 0x317   : > { %2333 = vpow2.f32 %v1336_v63 }
 0x31a   : > { %v2332_v0 = vpop.eup %2331 }
 0x31b   : > { %v1338_v1 = vsel %vm1044_vm9, %v2332_v0, 0.0 }
 0x31c   : > { %1339 = vadd.xlane.f32.xlu2 %v1338_v1 }
 0x31d   : > { %v2334_v3 = vpop.eup %2333 }
 0x31e   : > { %v1341_v7 = vsel %vm1044_vm9, %v2334_v3, 0.0 }
 0x31f   : > { %v1442_v13 = vpop.xlane.xlu2 %1441 }
 0x320   : > { %v1446_v18 = vsub.f32 %v3010_v31, %v1442_v13 }
 0x321   : > { %v1445_v4 = vpop.xlane.xlu1 %1444 }
 0x322   : > { %v1447_v6 = vsub.f32 %v1437_v33, %v1445_v4  ;;  %1350 = vrot.lane.b32.xlu0 %v3016_v38, %s2643_s5  ;;  %v1448_v21 = vmul.f32 1.442695, %v1446_v18 }
 0x324   : > { %v1450_v8 = vmul.f32 1.442695, %v1447_v6  ;;  %1342 = vadd.xlane.f32.xlu2 %v1341_v7 }
 0x325   : > { %v1234_v9 = vpop.permute.xlu0 %1233 }
 0x326   : > { %2335 = vpow2.f32 %v1450_v8  ;;  %v1239_v10 = vsel %vm1110_vm11, %v1234_v9, 0 }
 0x327   : > { %1248 = vmatpush.bf16.msra.mxu1 %v1239_v10  ;;  %v1372_v14 = vpop.permute.xlu2 %1371  ;;  %2337 = vpow2.f32 %v1448_v21 }
 0x328   : > { %v1377_v20 = vsel %vm1110_vm11, %v1372_v14, 0 }
 0x32c   : > { %v2336_v11 = vpop.eup %2335 }
 0x32d   : > { %v1455_v12 = vsel %vm1044_vm9, %v2336_v11, 0.0  ;;  %v2338_v22 = vpop.eup %2337 }
 0x32e   : > { %1456 = vadd.xlane.f32.xlu1 %v1455_v12  ;;  %v1452_v23 = vsel %vm1044_vm9, %v2338_v22, 0.0 }
 0x339   : > { %v1258_v17 = vpop.permute.xlu1 %1257 }
 0x33a   : > { %v1263_v19 = vsel %vm1110_vm11, %v1258_v17, 0 }
 0x33b   : > { %1272 = vmatpush.bf16.msra.mxu2 %v1263_v19 }
 0x33c   : > { %1485 = vrot.lane.b32.xlu2 %v1256_v41, %s2644_s13 }
 0x33f   : > { %1386 = vmatpush.bf16.msrb.mxu2 %v1377_v20 }
 0x344   : > { %1464 = vrot.lane.b32.xlu2 %v3016_v38, %s2644_s13 }
 0x34c   : > { %1453 = vadd.xlane.f32.xlu0 %v1452_v23 }
 0x37f   : > { %v1220_v24 = vpop.xlane.xlu2 %1219 }
 0x380   : > { %2339 = vrcp.f32 %v1220_v24 }
 0x381   : > { %v1223_v25 = vpop.xlane.xlu0 %1222 }
 0x382   : > { %2341 = vrcp.f32 %v1223_v25 }
 0x386   : > { %v2340_v26 = vpop.eup %2339 }
 0x387   : > { %v1226_v27 = vmul.f32 %v2340_v26, %v2324_v48 }
 0x388   : > { %v2342_v28 = vpop.eup %2341 }
 0x389   : > { %v1228_v29 = vpack.c.bf16 %v1226_v27, %v1226_v27  ;;  %v1227_v31 = vmul.f32 %v2342_v28, %v2326_v50  ;;  %v2186_v27 = vld [vmem:[%s2924_s19 + $0x8] sm:$0xff]  ;;  %v2185_v28 = vld [vmem:[%s2924_s19] sm:$0xff] }
 0x38a   : > { %1580 = vmatpush.bf16.msra.mxu3 %v2186_v27 }
 0x38b   : > { %v1229_v32 = vpack.c.bf16 %v1227_v31, %v1227_v31  ;;  %2123 = vmatmul.msk.bf16.vlgmr.msra.gmra.mxu1 %vm1044_vm9, %v1228_v29 }
 0x38d   : > { %2124 = vmatmul.msk.bf16.vlgmr.msra.gmra.mxu2 %vm1044_vm9, %v1229_v32 }
 0x38e   : > { %1581 = vmatpush.bf16.msra.mxu3 %v2185_v28 }
 0x38f   : > { %v1340_v33 = vpop.xlane.xlu2 %1339 }
 0x390   : > { %2343 = vrcp.f32 %v1340_v33 }
 0x391   : > { %v3042_v34 = vpop.f32.mrf.mxu1 }
 0x392   : > { %v1146_v33 = vpack.c.bf16 %v3042_v34, %v3042_v34 }
 0x394   : > { %v1351_v35 = vpop.permute.xlu0 %1350 }
 0x395   : > { %v1356_v36 = vsel %vm1110_vm11, %v1351_v35, 0 }
 0x396   : > { %v2344_v37 = vpop.eup %2343  ;;  %1365 = vmatpush.bf16.msrb.mxu1 %v1356_v36 }
 0x397   : > { %v1346_v38 = vmul.f32 %v2344_v37, %v2332_v0  ;;  %v1343_v39 = vpop.xlane.xlu2 %1342 }
 0x398   : > { %2345 = vrcp.f32 %v1343_v39 }
 0x399   : > { %v1348_v40 = vpack.c.bf16 %v1346_v38, %v1346_v38  ;;  %v1125_v41 = vpop.f32.mrf.mxu1  ;;  %v3045_v42 = vpop.f32.mrf.mxu2 }
 0x39a   : > { %v1147_v36 = vpack.c.bf16 %v3045_v42, %v3045_v42 }
 0x39b   : > { %2127 = vmatmul.msk.bf16.vlgmr.msrb.gmra.mxu1 %vm1044_vm9, %v1348_v40 }
 0x39e   : > { %v2346_v43 = vpop.eup %2345 }
 0x39f   : > { %v1347_v15 = vmul.f32 %v2346_v43, %v2334_v3  ;;  %v1486_v44 = vpop.permute.xlu2 %1485 }
 0x3a0   : > { %v1491_v45 = vsel %vm1110_vm11, %v1486_v44, 0 }
 0x3a1   : > { %v1349_v46 = vpack.c.bf16 %v1347_v15, %v1347_v15  ;;  %v1144_v47 = vpop.f32.mrf.mxu2  ;;  %1500 = vmatpush.bf16.msra.mxu2 %v1491_v45  ;;  %v1457_v48 = vpop.xlane.xlu1 %1456 }
 0x3a2   : > { %2347 = vrcp.f32 %v1457_v48 }
 0x3a3   : > { %2128 = vmatmul.msk.bf16.vlgmr.msrb.gmra.mxu2 %vm1044_vm9, %v1349_v46 }
 0x3a7   : > { %v1465_v49 = vpop.permute.xlu2 %1464 }
 0x3a8   : > { %v1470_v30 = vsel %vm1110_vm11, %v1465_v49, 0  ;;  %v2348_v50 = vpop.eup %2347 }
 0x3a9   : > { %1479 = vmatpush.bf16.msra.mxu1 %v1470_v30  ;;  %v1461_v51 = vmul.f32 %v2348_v50, %v2336_v11 }
 0x3ab   : > { %v1463_v52 = vpack.c.bf16 %v1461_v51, %v1461_v51 }
 0x3b3   : > { %2132 = vmatmul.msk.bf16.vlgmr.msra.gmra.mxu2 %vm1044_vm9, %v1463_v52 }
 0x3bf   : > { %v1454_v53 = vpop.xlane.xlu0 %1453 }
 0x3c0   : > { %2349 = vrcp.f32 %v1454_v53 }
 0x3c6   : > { %v2350_v54 = vpop.eup %2349 }
 0x3c7   : > { %v1460_v55 = vmul.f32 %v2350_v54, %v2338_v22 }
 0x3c9   : > { %v1462_v56 = vpack.c.bf16 %v1460_v55, %v1460_v55 }
 0x3cb   : > { %2131 = vmatmul.msk.bf16.vlgmr.msra.gmra.mxu1 %vm1044_vm9, %v1462_v56 }
 0x408   : > { %v1250_v57 = vpop.f32.mrf.mxu1 }
 0x409   : > { %v1278_v58 = vpack.c.bf16 %v1250_v57, %v1250_v57 }
 0x40b   : > { %v1510_v59 = vunpack.c.l.b16 %v1278_v58 }
 0x40d   : > { %v1512_v60 = vpack.c.b16 %v1510_v59, %v1510_v59 }
 0x40f   : > { %1514 = vrot.lane.b32.xlu2 %v1512_v60, %s2645_s25 }
 0x410   : > { %v1252_v61 = vpop.f32.mrf.mxu1  ;;  %v1274_v62 = vpop.f32.mrf.mxu2 }
 0x411   : > { %v1279_v63 = vpack.c.bf16 %v1274_v62, %v1274_v62 }
 0x413   : > { %v1511_v0 = vunpack.c.l.b16 %v1279_v63  ;;  %v2188_v63 = vld [vmem:[%s2926_s6 + $0x8] sm:$0xff] }
 0x414   : > { %1701 = vmatpush.bf16.msrb.mxu0 %v2188_v63 }
 0x415   : > { %v1513_v1 = vpack.c.b16 %v1511_v0, %v1511_v0 }
 0x417   : > { %1516 = vrot.lane.b32.xlu1 %v1513_v1, %s2645_s25 }
 0x418   : > { %v1276_v3 = vpop.f32.mrf.mxu2  ;;  %v1367_v4 = vpop.f32.mrf.mxu1 }
 0x419   : > { %v1392_v6 = vpack.c.bf16 %v1367_v4, %v1367_v4  ;;  %v2187_v4 = vld [vmem:[%s2926_s6] sm:$0xff] }
 0x41a   : > { %1702 = vmatpush.bf16.msrb.mxu0 %v2187_v4 }
 0x41b   : > { %v1520_v7 = vunpack.c.l.b16 %v1392_v6 }
 0x41d   : > { %v1522_v8 = vpack.c.b16 %v1520_v7, %v1520_v7 }
 0x41f   : > { %1524 = vrot.lane.b32.xlu2 %v1522_v8, %s2646_s28 }
 0x420   : > { %v1369_v9 = vpop.f32.mrf.mxu1 }
 0x426   : > { %v1388_v10 = vpop.f32.mrf.mxu2 }
 0x427   : > { %v1393_v11 = vpack.c.bf16 %v1388_v10, %v1388_v10 }
 0x429   : > { %v1521_v12 = vunpack.c.l.b16 %v1393_v11 }
 0x42b   : > { %v1523_v13 = vpack.c.b16 %v1521_v12, %v1521_v12 }
 0x42d   : > { %1526 = vrot.lane.b32.xlu0 %v1523_v13, %s2646_s28  ;;  %v2192_v13 = vld [vmem:[%s2917_s16 + $0x18] sm:$0xff] }
 0x42e   : > { %v1390_v14 = vpop.f32.mrf.mxu2  ;;  %1747 = vmatpush.bf16.msrb.mxu1 %v2192_v13 }
 0x436   : > { %v1502_v17 = vpop.f32.mrf.mxu2 }
 0x437   : > { %v1507_v22 = vpack.c.bf16 %v1502_v17, %v1502_v17 }
 0x439   : > { %v1531_v25 = vunpack.c.l.b16 %v1507_v22 }
 0x43b   : > { %v1533_v26 = vpack.c.b16 %v1531_v25, %v1531_v25  ;;  %v2309_v25 = vld [vmem:[%s3220_s14] ss:$0 sm:$0xff] }
 0x43e   : > { %v1504_v18 = vpop.f32.mrf.mxu2 }
 0x448   : > { %v1481_v19 = vpop.f32.mrf.mxu1 }
 0x449   : > { %v1506_v20 = vpack.c.bf16 %v1481_v19, %v1481_v19 }
 0x44b   : > { %v1530_v21 = vunpack.c.l.b16 %v1506_v20 }
 0x44d   : > { %v1532_v23 = vpack.c.b16 %v1530_v21, %v1530_v21 }
 0x44f   : > { %1534 = vrot.lane.b32.xlu2 %v1532_v23, %s2647_s2 }
 0x450   : > { %v1483_v24 = vpop.f32.mrf.mxu1 }
 0x457   : > { %1536 = vrot.lane.b32.xlu2 %v1533_v26, %s2647_s2 }
 0x469   : > { %v1515_v29 = vpop.permute.xlu2 %1514 }
 0x46a   : > { %v1540_v37 = vsel %vm1044_vm9, %v1146_v33, %v1515_v29 }
 0x479   : > { %v1525_v31 = vpop.permute.xlu2 %1524 }
 0x47a   : > { %v1546_v39 = vsel %vm1544_vm12, %v1540_v37, %v1525_v31  ;;  %v2310_v31 = vld [vmem:[%s822_s3] ss:$0 sm:$0xff] }
 0x489   : > { %v1517_v35 = vpop.permute.xlu1 %1516 }
 0x48a   : > { %v1543_v40 = vsel %vm1044_vm9, %v1147_v36, %v1517_v35 }
 0x49f   : > { %v1527_v38 = vpop.permute.xlu0 %1526 }
 0x4a0   : > { %v1548_v43 = vsel %vm1544_vm12, %v1543_v40, %v1527_v38 }
 0x4a9   : > { %v1535_v32 = vpop.permute.xlu2 %1534 }
 0x4aa   : > { %v1551_v41 = vsel %vm1549_vm13, %v1546_v39, %v1535_v32 }
 0x4ab   : > { %v1556_v45 = vunpack.c.l.b16 %v1551_v41 }
 0x4b1   : > { %v1537_v15 = vpop.permute.xlu2 %1536 }
 0x4b2   : > { %v1553_v44 = vsel %vm1549_vm13, %v1548_v43, %v1537_v15 }
 0x4b3   : > { %v1557_v46 = vunpack.c.l.b16 %v1553_v44 }
 0x4b5   : > { %v1558_v47 = vpack.c.b16 %v1557_v46, %v1556_v45  ;;  %v2191_v45 = vld [vmem:[%s2917_s16 + $0x10] sm:$0xff]  ;;  %v2190_v46 = vld [vmem:[%s2917_s16 + $0x8] sm:$0xff] }
 0x4b6   : > { %1748 = vmatpush.bf16.msrb.mxu1 %v2191_v45 }
 0x4b7   : > { %2141 = vmatmul.msk.bf16.vlgmr.msra.gmra.mxu3 %vm851_vm1, %v1558_v47  ;;  %v2189_v47 = vld [vmem:[%s2917_s16] sm:$0xff] }
 0x4ba   : > { %1749 = vmatpush.bf16.msrb.mxu1 %v2190_v46 }
 0x4be   : > { %1750 = vmatpush.bf16.msrb.mxu1 %v2189_v47 }
 0x53a   : > { %v1583_v34 = vpop.f32.mrf.mxu3 }
 0x53b   : > { %v1588_v48 = vadd.f32 %v1583_v34, %v2929_v2 }
 0x53d   : > { %1590 = vst.msk [vmem:[#allocation12] sm:$0xff] %vm851_vm1, %v1588_v48  ;;  %v2311_v48 = vld [vmem:[%s825_s20] ss:$0 sm:$0xff]  ;;  %s3224_s20 = sld [smem:[#allocation34_spill]] (!%p2168_p3) }
 0x542   : > { %v1585_v42 = vpop.f32.mrf.mxu3 }
 0x543   : > { %v1589_v49 = vadd.f32 %v1585_v42, %v2935_v5 }
 0x544   : > { %v3067_v30 = vld [vmem:[#allocation12] sm:$0xff] }
 0x545   : > { %1591 = vst.msk [vmem:[#allocation12 + $0x8] sm:$0xff] %vm851_vm1, %v1589_v49  ;;  %v1610_v50 = vsel %vm851_vm1, %v3067_v30, 0.0  ;;  %v1618_v51 = vmul.f32 %v3067_v30, %v3067_v30 }
 0x546   : > { %1611 = vadd.xlane.f32.xlu1 %v1610_v50 }
 0x547   : > { %v1620_v52 = vsel %vm851_vm1, %v1618_v51, 0.0 }
 0x548   : > { %1621 = vadd.xlane.f32.xlu2 %v1620_v52 }
 0x54c   : > { %v3075_v2 = vld [vmem:[#allocation12 + $0x8] sm:$0xff] }
 0x54d   : > { %v1613_v5 = vsel %vm851_vm1, %v3075_v2, 0.0  ;;  %v1619_v53 = vmul.f32 %v3075_v2, %v3075_v2 }
 0x54e   : > { %1614 = vadd.xlane.f32.xlu0 %v1613_v5 }
 0x54f   : > { %v1623_v54 = vsel %vm851_vm1, %v1619_v53, 0.0  ;;  %v2312_v53 = vld [vmem:[%s833_s30] ss:$0 sm:$0xff] }
 0x550   : > { %1624 = vadd.xlane.f32.xlu1 %v1623_v54 }
 0x5b9   : > { %v1612_v55 = vpop.xlane.xlu1 %1611 }
 0x5ba   : > { %v1616_v56 = vmul.f32 %v1612_v55, %v2943_v16 }
 0x5bb   : > { %v1622_v57 = vpop.xlane.xlu2 %1621 }
 0x5bc   : > { %v1628_v58 = vmul.f32 %v1616_v56, %v1616_v56  ;;  %v1626_v59 = vmul.f32 %v1622_v57, %v2943_v16  ;;  %v1634_v22 = vsub.f32 %v3067_v30, %v1616_v56 }
 0x5be   : > { %v1630_v60 = vsub.f32 %v1626_v59, %v1628_v58 }
 0x5c0   : > { %v1632_v61 = vmax.f32 %v1630_v60, 0.0 }
 0x5c1   : > { %v1615_v62 = vpop.xlane.xlu0 %1614 }
 0x5c2   : > { %v1636_v0 = vadd.f32 1e-05, %v1632_v61  ;;  %v1617_v1 = vmul.f32 %v1615_v62, %v2943_v16 }
 0x5c3   : > { %v1625_v3 = vpop.xlane.xlu1 %1624 }
 0x5c4   : > { %2351 = vrsqrt.f32 %v1636_v0  ;;  %v1629_v6 = vmul.f32 %v1617_v1, %v1617_v1  ;;  %v1627_v7 = vmul.f32 %v1625_v3, %v2943_v16  ;;  %vm1644_vm15 = vweird.f32 %v1636_v0 }
 0x5c5   : > { %v1635_v33 = vsub.f32 %v3075_v2, %v1617_v1 }
 0x5c6   : > { %v1631_v8 = vsub.f32 %v1627_v7, %v1629_v6 }
 0x5c8   : > { %v1633_v9 = vmax.f32 %v1631_v8, 0.0 }
 0x5ca   : > { %v2352_v10 = vpop.eup %2351  ;;  %v1637_v12 = vadd.f32 1e-05, %v1633_v9 }
 0x5cb   : > { %v1639_v11 = vmul.f32 %v2352_v10, %v1636_v0  ;;  %vm1645_vm14 = vweird.f32 %v2352_v10 }
 0x5cc   : > { %2353 = vrsqrt.f32 %v1637_v12  ;;  %vm1646_vm0 = vmor %vm1644_vm15, %vm1645_vm14  ;;  %vm1654_vm3 = vweird.f32 %v1637_v12 }
 0x5cd   : > { %v1640_v14 = vmul.f32 %v2352_v10, %v1639_v11 }
 0x5cf   : > { %v1641_v17 = vmul.f32 0.5, %v1640_v14 }
 0x5d1   : > { %v1642_v18 = vsub.f32 1.5, %v1641_v17 }
 0x5d2   : > { %v2354_v19 = vpop.eup %2353 }
 0x5d3   : > { %v1643_v20 = vmul.f32 %v2352_v10, %v1642_v18  ;;  %v1649_v21 = vmul.f32 %v2354_v19, %v1637_v12  ;;  %vm1655_vm2 = vweird.f32 %v2354_v19 }
 0x5d4   : > { %vm1656_vm4 = vmor %vm1654_vm3, %vm1655_vm2 }
 0x5d5   : > { %v1647_v23 = vsel %vm1646_vm0, %v2352_v10, %v1643_v20  ;;  %v1650_v24 = vmul.f32 %v2354_v19, %v1649_v21 }
 0x5d6   : > { %v1658_v26 = vmul.f32 %v1647_v23, %v1634_v22 }
 0x5d7   : > { %v1651_v27 = vmul.f32 0.5, %v1650_v24 }
 0x5d8   : > { %v1663_v29 = vmul.f32 %v2309_v25, %v1658_v26 }
 0x5d9   : > { %v1652_v28 = vsub.f32 1.5, %v1651_v27 }
 0x5da   : > { %v1668_v37 = vadd.f32 %v2310_v31, %v1663_v29 }
 0x5db   : > { %v1653_v32 = vmul.f32 %v2354_v19, %v1652_v28 }
 0x5dc   : > { %v1670_v40 = vpack.c.bf16 %v1668_v37, %v1668_v37 }
 0x5dd   : > { %v1657_v35 = vsel %vm1656_vm4, %v2354_v19, %v1653_v32 }
 0x5de   : > { %v1659_v36 = vmul.f32 %v1657_v35, %v1635_v33  ;;  %v1677_v43 = vunpack.c.l.b16 %v1670_v40 }
 0x5e0   : > { %v1664_v38 = vmul.f32 %v2309_v25, %v1659_v36 }
 0x5e2   : > { %v1669_v39 = vadd.f32 %v2310_v31, %v1664_v38 }
 0x5e4   : > { %v1671_v41 = vpack.c.bf16 %v1669_v39, %v1669_v39 }
 0x5e6   : > { %v1678_v15 = vunpack.c.l.b16 %v1671_v41 }
 0x5e8   : > { %v1679_v44 = vpack.c.b16 %v1678_v15, %v1677_v43 }
 0x5ea   : > { %2150 = vmatmul.msk.bf16.vlgmr.msrb.gmra.mxu0 %vm851_vm1, %v1679_v44 }
 0x667   : > { %v1704_v34 = vpop.f32.mrf.mxu0 }
 0x668   : > { %v1705_v42 = vadd.f32 %v2311_v48, %v1704_v34 }
 0x66a   : > { %v1709_v51 = vmax.f32 %v1705_v42, 0.0 }
 0x66f   : > { %v1706_v49 = vpop.f32.mrf.mxu0 }
 0x670   : > { %v1707_v50 = vadd.f32 %v2311_v48, %v1706_v49 }
 0x672   : > { %v1710_v52 = vmax.f32 %v1707_v50, 0.0 }
 0x674   : > { %v1711_v5 = vpack.c.bf16 %v1710_v52, %v1709_v51 }
 0x676   : > { %2167 = vmatmul.msk.bf16.vlgmr.msrb.gmra.mxu1 %vm1739_vm5, %v1711_v5 }
 0x6f3   : > { %v1752_v54 = vpop.f32.mrf.mxu1 }
 0x6f4   : > { %v1753_v55 = vadd.f32 %v2312_v53, %v1752_v54 }
 0x6f6   : > { %v1757_v56 = vadd.f32 %v1753_v55, %v3067_v30 }
 0x6f8   : > { %1759 = vst.msk [vmem:[#allocation12] sm:$0xff] %vm851_vm1, %v1757_v56 }
 0x6fb   : > { %v1754_v57 = vpop.f32.mrf.mxu1 }
 0x6fc   : > { %v1755_v58 = vadd.f32 %v2312_v53, %v1754_v57  ;;  %1764 = sbr.rel (%p2168_p3) target bundleno = 1954 (0x7a2), region = 116 }
 0x6fe   : > { %v1758_v59 = vadd.f32 %v1755_v58, %v3075_v2 }
 0x700   : > { %1760 = vst.msk [vmem:[#allocation12 + $0x8] sm:$0xff] %vm851_vm1, %v1758_v59 }
 0x701   : > { %v1765_v60 = vld [vmem:[#allocation12] sm:$0xff] }
 0x702   : > { %v1769_v61 = vsel %vm851_vm1, %v1765_v60, 0.0  ;;  %v1777_v62 = vmul.f32 %v1765_v60, %v1765_v60  ;;  %v2355_v31 = vld [vmem:[%s3224_s20] ss:$0 sm:$0xff] }
 0x703   : > { %1770 = vadd.xlane.f32.xlu0 %v1769_v61  ;;  %v2356_v33 = vld [vmem:[%s3225_s21] ss:$0 sm:$0xff] }
 0x704   : > { %v1779_v0 = vsel %vm851_vm1, %v1777_v62, 0.0 }
 0x705   : > { %1780 = vadd.xlane.f32.xlu1 %v1779_v0 }
 0x707   : > { %v1766_v63 = vld [vmem:[#allocation12 + $0x8] sm:$0xff] }
 0x708   : > { %v1778_v30 = vmul.f32 %v1766_v63, %v1766_v63  ;;  %v1772_v1 = vsel %vm851_vm1, %v1766_v63, 0.0 }
 0x70a   : > { %v1782_v3 = vsel %vm851_vm1, %v1778_v30, 0.0 }
 0x70b   : > { %1773 = vadd.xlane.f32.xlu0 %v1772_v1 }
 0x70d   : > { %1783 = vadd.xlane.f32.xlu1 %v1782_v3 }
 0x776   : > { %v1771_v2 = vpop.xlane.xlu0 %1770 }
 0x777   : > { %v1775_v4 = vmul.f32 %v1771_v2, %v2943_v16 }
 0x778   : > { %v1781_v6 = vpop.xlane.xlu1 %1780 }
 0x779   : > { %v1787_v7 = vmul.f32 %v1775_v4, %v1775_v4  ;;  %v1785_v8 = vmul.f32 %v1781_v6, %v2943_v16  ;;  %v1793_v29 = vsub.f32 %v1765_v60, %v1775_v4 }
 0x77b   : > { %v1789_v9 = vsub.f32 %v1785_v8, %v1787_v7 }
 0x77d   : > { %v1791_v10 = vmax.f32 %v1789_v9, 0.0 }
 0x77e   : > { %v1774_v11 = vpop.xlane.xlu0 %1773 }
 0x77f   : > { %v1795_v12 = vadd.f32 1e-05, %v1791_v10  ;;  %v1776_v13 = vmul.f32 %v1774_v11, %v2943_v16 }
 0x780   : > { %v1784_v14 = vpop.xlane.xlu1 %1783 }
 0x781   : > { %2357 = vrsqrt.f32 %v1795_v12  ;;  %v1788_v17 = vmul.f32 %v1776_v13, %v1776_v13  ;;  %v1786_v18 = vmul.f32 %v1784_v14, %v2943_v16  ;;  %vm1803_vm7 = vweird.f32 %v1795_v12 }
 0x782   : > { %v1794_v43 = vsub.f32 %v1766_v63, %v1776_v13 }
 0x783   : > { %v1790_v19 = vsub.f32 %v1786_v18, %v1788_v17 }
 0x785   : > { %v1792_v20 = vmax.f32 %v1790_v19, 0.0 }
 0x787   : > { %v2358_v21 = vpop.eup %2357  ;;  %v1796_v23 = vadd.f32 1e-05, %v1792_v20 }
 0x788   : > { %v1798_v22 = vmul.f32 %v2358_v21, %v1795_v12  ;;  %vm1804_vm6 = vweird.f32 %v2358_v21 }
 0x789   : > { %2359 = vrsqrt.f32 %v1796_v23  ;;  %vm1805_vm8 = vmor %vm1803_vm7, %vm1804_vm6  ;;  %vm1813_vm10 = vweird.f32 %v1796_v23 }
 0x78a   : > { %v1799_v24 = vmul.f32 %v2358_v21, %v1798_v22 }
 0x78c   : > { %v1800_v25 = vmul.f32 0.5, %v1799_v24 }
 0x78e   : > { %v1801_v26 = vsub.f32 1.5, %v1800_v25 }
 0x78f   : > { %v2360_v27 = vpop.eup %2359 }
 0x790   : > { %v1802_v28 = vmul.f32 %v2358_v21, %v1801_v26  ;;  %v1808_v16 = vmul.f32 %v2360_v27, %v1796_v23  ;;  %vm1814_vm9 = vweird.f32 %v2360_v27 }
 0x791   : > { %vm1815_vm11 = vmor %vm1813_vm10, %vm1814_vm9 }
 0x792   : > { %v1806_v32 = vsel %vm1805_vm8, %v2358_v21, %v1802_v28  ;;  %v1809_v36 = vmul.f32 %v2360_v27, %v1808_v16 }
 0x793   : > { %v1817_v35 = vmul.f32 %v1806_v32, %v1793_v29 }
 0x794   : > { %v1810_v38 = vmul.f32 0.5, %v1809_v36 }
 0x795   : > { %v1822_v37 = vmul.f32 %v2355_v31, %v1817_v35 }
 0x796   : > { %v1811_v40 = vsub.f32 1.5, %v1810_v38 }
 0x797   : > { %v1827_v39 = vadd.f32 %v2356_v33, %v1822_v37 }
 0x798   : > { %v1812_v41 = vmul.f32 %v2360_v27, %v1811_v40 }
 0x799   : > { %1829 = vst.msk [vmem:[#allocation12] sm:$0xff] %vm851_vm1, %v1827_v39 }
 0x79a   : > { %v1816_v15 = vsel %vm1815_vm11, %v2360_v27, %v1812_v41 }
 0x79b   : > { %v1818_v44 = vmul.f32 %v1816_v15, %v1794_v43 }
 0x79d   : > { %v1823_v45 = vmul.f32 %v2355_v31, %v1818_v44 }
 0x79f   : > { %v1828_v46 = vadd.f32 %v2356_v33, %v1823_v45 }
 0x7a1   : > { %1830 = vst.msk [vmem:[#allocation12 + $0x8] sm:$0xff] %vm851_vm1, %v1828_v46 }
 0x7a2 PF: > { %p2238_p4 = scmp.eq.s32.totalorder %s2764_s27, 1  ;;  %s3226_s1 = sld [smem:[#allocation36_spill]] }
 0x7a3   : > { %s2648_s5 = smov [#allocation12]   ;;  %s2649_s28 = smov 128  }
 0x7a4   : > { %s1839_s13 = sshll.u32 %s2648_s5, 4  ;;  %s1840_s13 = int_to_ptr.vmem [resolvable:$true] %s1839_s13 }
 0x7a8   : > { %s1841_s4 = sshll.u32 %s3226_s1, 4  ;;  %s1842_s4 = int_to_ptr.hbm [resolvable:$true] %s1841_s4 }
 0x7a9   : > { %2210 = dma.vmem_to_hbm [thread:$0]  (%p2238_p4), %s1840_s13, 256, %s1842_s4, [#allocation5], %s2649_s28, %s2649_s28, %s2645_s25  }
 0x7aa   : > { %2606 = dma.done.wait (%p2238_p4), [#allocation5], 256  }
 0x7ab   : > { %2608 = vsyncadd (%p2238_p4), [#allocation5], 4294967040 }
 0x7ac PF: > { %s3227_s2 = sld [smem:[#allocation19_spill]]  ;;  %s3232_s21 = smov %s2615_s22 }
 0x7ad   : > { %s3228_s11 = sld [smem:[#allocation17_spill]] }
 0x7ae   : > { %s3229_s23 = sld [smem:[#allocation21_spill]] }
 0x7af   : > { %s3230_s24 = sld [smem:[#allocation18_spill]] }
 0x7b0   : > { %s3231_s25 = sld [smem:[#allocation20_spill]] }
 0x7b2   : > { %s29_s26 = sadd.s32 1, %s3227_s2  }
 0x7b3   : > { %p26_p5 = scmp.ge.s32.totalorder %s29_s26, 4   ;;  %s3233_s22 = smov %s3228_s11 }
 0x7b5   :  { %28 = sbr.rel (!%p26_p5) target bundleno = 21 (0x15), region = 196 }
 0x7ba   :  { %1858 = vsyncpa [#allocation4], 1 }
 0x7bb   :  { %1860 = vsyncpa [#allocation4 + $0x1], 1 }
 0x7bc   :  { %1861 = vsyncpa [#allocation7], 1 }
 0x7bd   :  { %1862 = vsyncpa [#allocation5], 1 }
 0x7be   :  { %1864 = vsyncpa [#allocation5 + $0x1], 1 }

</bundles_post_ra>
